<compile_context>
chip_gen: v7x
topology: tpu7x:2x2x1
jax: 0.10.0
libtpu: 0.0.40
codegen_flags: <defaults>
</compile_context>

<pallas_src>
import functools

import jax
import jax.numpy as jnp
from jax import lax
from jax.experimental import pallas as pl
from jax.experimental.pallas import tpu as pltpu


def _attention_kernel(x_ref, wqkv_ref, wproj_ref, bproj_ref, o_ref, ctx_ref,
                      *, num_heads, head_dim, dim):
    """One grid step == one batch element.

    x_ref    : (1, N, C)  bf16 input tile
    wqkv_ref : (C, 3C)    bf16 fused, pre-transposed [Wq.T | Wk.T | Wv.T]
    wproj_ref: (C, C)     bf16 pre-transposed Wp.T
    bproj_ref: (1, C)     f32 proj bias
    o_ref    : (1, N, C)  output tile
    ctx_ref  : (N, C)     f32 VMEM scratch (per-head context slab)
    """
    C = dim
    scale = head_dim ** (-0.5)

    x = x_ref[0]                                                        # (N, C) bf16
    # Fused Q/K/V projection: one MXU matmul, f32 accumulation.
    qkv = jnp.dot(x, wqkv_ref[...], preferred_element_type=jnp.float32)  # (N, 3C)

    # Per-head scaled dot-product attention, statically unrolled over heads.
    for h in range(num_heads):
        lo = h * head_dim
        hi = lo + head_dim
        qh = (qkv[:, lo:hi] * scale).astype(jnp.bfloat16)               # (N, D)
        kh = qkv[:, C + lo:C + hi].astype(jnp.bfloat16)                 # (N, D)
        vh = qkv[:, 2 * C + lo:2 * C + hi].astype(jnp.bfloat16)         # (N, D)

        # s = qh @ kh.T without materializing a transpose (contract last dims).
        s = lax.dot_general(qh, kh, (((1,), (1,)), ((), ())),
                            preferred_element_type=jnp.float32)         # (N, N) f32

        # Numerically stable softmax in f32; divide goes to the EUP.
        s = s - jnp.max(s, axis=-1, keepdims=True)
        p = jnp.exp(s)
        p = p * pl.reciprocal(jnp.sum(p, axis=-1, keepdims=True), approx=True)

        oh = jnp.dot(p.astype(jnp.bfloat16), vh,
                     preferred_element_type=jnp.float32)                # (N, D) f32
        ctx_ref[:, lo:hi] = oh                                          # slab write

    # Output projection (single MXU matmul) + bias.
    ctx = ctx_ref[...].astype(jnp.bfloat16)                             # (N, C)
    y = jnp.dot(ctx, wproj_ref[...], preferred_element_type=jnp.float32)
    y = y + bproj_ref[0]
    o_ref[0] = y.astype(o_ref.dtype)


def attention_pallas(x, wq, wk, wv, wp, bp, *, num_heads):
    """x: (B, N, C) f32; wq/wk/wv/wp: (C, C) PyTorch (out, in) layout; bp: (C,)."""
    B, N, C = x.shape
    head_dim = C // num_heads

    # Host-side (cheap XLA) weight prep, once per call: fused + pre-transposed
    # QKV weight, pre-transposed proj weight, bf16 MXU inputs.
    w_qkv = jnp.concatenate([wq, wk, wv], axis=0).T.astype(jnp.bfloat16)  # (C, 3C)
    w_proj = wp.T.astype(jnp.bfloat16)                                    # (C, C)
    bp2d = bp.reshape(1, C).astype(jnp.float32)
    x_bf16 = x.astype(jnp.bfloat16)

    kernel = functools.partial(_attention_kernel, num_heads=num_heads,
                               head_dim=head_dim, dim=C)

    return pl.pallas_call(
        kernel,
        out_shape=jax.ShapeDtypeStruct((B, N, C), x.dtype),
        grid_spec=pltpu.PrefetchScalarGridSpec(
            num_scalar_prefetch=0,
            grid=(B,),
            in_specs=[
                pl.BlockSpec((1, N, C), lambda b: (b, 0, 0)),       # x
                pl.BlockSpec((C, 3 * C), lambda b: (0, 0)),         # W_qkv (fused)
                pl.BlockSpec((C, C), lambda b: (0, 0)),             # W_proj.T
                pl.BlockSpec((1, C), lambda b: (0, 0)),             # b_proj
            ],
            out_specs=pl.BlockSpec((1, N, C), lambda b: (b, 0, 0)),
            scratch_shapes=[pltpu.VMEM((N, C), jnp.float32)],
        ),
        compiler_params=pltpu.CompilerParams(
            dimension_semantics=("parallel",)),
    )(x_bf16, w_qkv, w_proj, bp2d)


def attention_reference(x, wq, wk, wv, wp, bp, *, num_heads):
    """Plain-JAX f32 mirror of the PyTorch forward, for verification."""
    B, N, C = x.shape
    D = C // num_heads
    scale = D ** (-0.5)

    def heads(t):  # (B, N, C) -> (B, H, N, D)
        return t.reshape(B, N, num_heads, D).transpose(0, 2, 1, 3)

    q = heads(x @ wq.T)
    k = heads(x @ wk.T)
    v = heads(x @ wv.T)
    attn = jnp.einsum("bhnd,bhmd->bhnm", q, k) * scale
    attn = jax.nn.softmax(attn, axis=-1)
    ctx = jnp.einsum("bhnm,bhmd->bhnd", attn, v)
    ctx = ctx.transpose(0, 2, 1, 3).reshape(B, N, C)
    return ctx @ wp.T + bp


if __name__ == "__main__":
    B, N, C = 2, 16, 64
    num_heads = 8

    key = jax.random.PRNGKey(0)
    kx, kq, kk, kv, kp, kb = jax.random.split(key, 6)

    x = jax.random.normal(kx, (B, N, C), dtype=jnp.float32)
    wq = 0.05 * jax.random.normal(kq, (C, C), dtype=jnp.float32)
    wk = 0.05 * jax.random.normal(kk, (C, C), dtype=jnp.float32)
    wv = 0.05 * jax.random.normal(kv, (C, C), dtype=jnp.float32)
    wp = 0.05 * jax.random.normal(kp, (C, C), dtype=jnp.float32)
    bp = 0.05 * jax.random.normal(kb, (C,), dtype=jnp.float32)

    out = attention_pallas(x, wq, wk, wv, wp, bp, num_heads=num_heads)
    out = jax.block_until_ready(out)

    ref = attention_reference(x, wq, wk, wv, wp, bp, num_heads=num_heads)
    # Kernel uses bf16 MXU inputs with f32 accumulation -> compare with a
    # bf16-appropriate tolerance against the pure-f32 reference.
    assert jnp.allclose(out, ref, atol=2e-2, rtol=2e-2), "mismatch vs reference"

    print("KERNEL_OK")
</pallas_src>

<mosaic_0001>
module attributes {stable_mosaic.version = 11 : i64} {
  func.func @_attention_kernel(%arg0: i32, %arg1: memref<1x16x64xbf16, #tpu.memory_space<vmem>>, %arg2: memref<64x192xbf16, #tpu.memory_space<vmem>>, %arg3: memref<64x64xbf16, #tpu.memory_space<vmem>>, %arg4: memref<1x64xf32, #tpu.memory_space<vmem>>, %arg5: memref<1x16x64xf32, #tpu.memory_space<vmem>>, %arg6: memref<16x64xf32, #tpu.memory_space<vmem>>) attributes {dimension_semantics = [#tpu.dimension_semantics<parallel>], iteration_bounds = array<i64: 2>, scalar_prefetch = 0 : i64, scratch_operands = 1 : i64, tpu.core_type = #tpu.core_type<tc>, window_params = [{transform_indices = @transform_0, window_bounds = array<i64: 1, 16, 64>}, {pipeline_mode = #tpu.pipeline_mode<synchronous>, transform_indices = @transform_1, window_bounds = array<i64: 64, 192>}, {pipeline_mode = #tpu.pipeline_mode<synchronous>, transform_indices = @transform_2, window_bounds = array<i64: 64, 64>}, {pipeline_mode = #tpu.pipeline_mode<synchronous>, transform_indices = @transform_3, window_bounds = array<i64: 1, 64>}, {transform_indices = @transform_4, window_bounds = array<i64: 1, 16, 64>}]} {
    %c0 = arith.constant 0 : index
    %c0_0 = arith.constant 0 : index
    %c0_1 = arith.constant 0 : index
    %0 = vector.load %arg1[%c0, %c0_0, %c0_1] : memref<1x16x64xbf16, #tpu.memory_space<vmem>>, vector<1x16x64xbf16>
    %1 = vector.shape_cast %0 : vector<1x16x64xbf16> to vector<16x64xbf16>
    %c0_2 = arith.constant 0 : index
    %c0_3 = arith.constant 0 : index
    %2 = vector.load %arg2[%c0_2, %c0_3] : memref<64x192xbf16, #tpu.memory_space<vmem>>, vector<64x192xbf16>
    %cst = arith.constant dense<0.000000e+00> : vector<16x192xf32>
    %3 = tpu.matmul %1, %2, %cst {dimension_numbers = #tpu.dot_dimension_numbers<[1], [0], [0], [1], [0, 0, 1, 1], [], []>} : vector<16x64xbf16>, vector<64x192xbf16>, vector<16x192xf32> -> vector<16x192xf32>
    %4 = vector.extract_strided_slice %3 {offsets = [0, 0], sizes = [16, 8], strides = [1, 1]} : vector<16x192xf32> to vector<16x8xf32>
    %cst_4 = arith.constant 0.353553385 : f32
    %5 = vector.broadcast %cst_4 : f32 to vector<16x8xf32>
    %6 = arith.mulf %4, %5 : vector<16x8xf32>
    %7 = arith.truncf %6 : vector<16x8xf32> to vector<16x8xbf16>
    %8 = vector.extract_strided_slice %3 {offsets = [0, 64], sizes = [16, 8], strides = [1, 1]} : vector<16x192xf32> to vector<16x8xf32>
    %9 = arith.truncf %8 : vector<16x8xf32> to vector<16x8xbf16>
    %10 = vector.extract_strided_slice %3 {offsets = [0, 128], sizes = [16, 8], strides = [1, 1]} : vector<16x192xf32> to vector<16x8xf32>
    %11 = arith.truncf %10 : vector<16x8xf32> to vector<16x8xbf16>
    %cst_5 = arith.constant dense<0.000000e+00> : vector<16x16xf32>
    %12 = tpu.matmul %7, %9, %cst_5 {dimension_numbers = #tpu.dot_dimension_numbers<[1], [1], [0], [0], [0, 0, 1, 0], [], []>} : vector<16x8xbf16>, vector<16x8xbf16>, vector<16x16xf32> -> vector<16x16xf32>
    %cst_6 = arith.constant dense<0xFF800000> : vector<16xf32>
    %13 = vector.multi_reduction <maximumf>, %12, %cst_6 [1] : vector<16x16xf32> to vector<16xf32>
    %14 = vector.shape_cast %13 : vector<16xf32> to vector<16x1xf32>
    %15 = vector.broadcast %14 : vector<16x1xf32> to vector<16x16xf32>
    %16 = arith.subf %12, %15 : vector<16x16xf32>
    %17 = math.exp %16 : vector<16x16xf32>
    %cst_7 = arith.constant dense<0.000000e+00> : vector<16xf32>
    %18 = vector.multi_reduction <add>, %17, %cst_7 [1] : vector<16x16xf32> to vector<16xf32>
    %19 = vector.shape_cast %18 : vector<16xf32> to vector<16x1xf32>
    %20 = tpu.reciprocal %19 {approx = true} : vector<16x1xf32> -> vector<16x1xf32>
    %21 = vector.broadcast %20 : vector<16x1xf32> to vector<16x16xf32>
    %22 = arith.mulf %17, %21 : vector<16x16xf32>
    %23 = arith.truncf %22 : vector<16x16xf32> to vector<16x16xbf16>
    %cst_8 = arith.constant dense<0.000000e+00> : vector<16x8xf32>
    %24 = tpu.matmul %23, %11, %cst_8 {dimension_numbers = #tpu.dot_dimension_numbers<[1], [0], [0], [1], [0, 0, 1, 1], [], []>} : vector<16x16xbf16>, vector<16x8xbf16>, vector<16x8xf32> -> vector<16x8xf32>
    %c0_9 = arith.constant 0 : index
    %c0_10 = arith.constant 0 : index
    %25 = vector.load %arg6[%c0_9, %c0_10] : memref<16x64xf32, #tpu.memory_space<vmem>>, vector<16x8xf32>
    tpu.vector_store %arg6[%c0_9, %c0_10], %24 {strides = array<i32>} : memref<16x64xf32, #tpu.memory_space<vmem>>, vector<16x8xf32>,
    %26 = vector.extract_strided_slice %3 {offsets = [0, 8], sizes = [16, 8], strides = [1, 1]} : vector<16x192xf32> to vector<16x8xf32>
    %cst_11 = arith.constant 0.353553385 : f32
    %27 = vector.broadcast %cst_11 : f32 to vector<16x8xf32>
    %28 = arith.mulf %26, %27 : vector<16x8xf32>
    %29 = arith.truncf %28 : vector<16x8xf32> to vector<16x8xbf16>
    %30 = vector.extract_strided_slice %3 {offsets = [0, 72], sizes = [16, 8], strides = [1, 1]} : vector<16x192xf32> to vector<16x8xf32>
    %31 = arith.truncf %30 : vector<16x8xf32> to vector<16x8xbf16>
    %32 = vector.extract_strided_slice %3 {offsets = [0, 136], sizes = [16, 8], strides = [1, 1]} : vector<16x192xf32> to vector<16x8xf32>
    %33 = arith.truncf %32 : vector<16x8xf32> to vector<16x8xbf16>
    %cst_12 = arith.constant dense<0.000000e+00> : vector<16x16xf32>
    %34 = tpu.matmul %29, %31, %cst_12 {dimension_numbers = #tpu.dot_dimension_numbers<[1], [1], [0], [0], [0, 0, 1, 0], [], []>} : vector<16x8xbf16>, vector<16x8xbf16>, vector<16x16xf32> -> vector<16x16xf32>
    %cst_13 = arith.constant dense<0xFF800000> : vector<16xf32>
    %35 = vector.multi_reduction <maximumf>, %34, %cst_13 [1] : vector<16x16xf32> to vector<16xf32>
    %36 = vector.shape_cast %35 : vector<16xf32> to vector<16x1xf32>
    %37 = vector.broadcast %36 : vector<16x1xf32> to vector<16x16xf32>
    %38 = arith.subf %34, %37 : vector<16x16xf32>
    %39 = math.exp %38 : vector<16x16xf32>
    %cst_14 = arith.constant dense<0.000000e+00> : vector<16xf32>
    %40 = vector.multi_reduction <add>, %39, %cst_14 [1] : vector<16x16xf32> to vector<16xf32>
    %41 = vector.shape_cast %40 : vector<16xf32> to vector<16x1xf32>
    %42 = tpu.reciprocal %41 {approx = true} : vector<16x1xf32> -> vector<16x1xf32>
    %43 = vector.broadcast %42 : vector<16x1xf32> to vector<16x16xf32>
    %44 = arith.mulf %39, %43 : vector<16x16xf32>
    %45 = arith.truncf %44 : vector<16x16xf32> to vector<16x16xbf16>
    %cst_15 = arith.constant dense<0.000000e+00> : vector<16x8xf32>
    %46 = tpu.matmul %45, %33, %cst_15 {dimension_numbers = #tpu.dot_dimension_numbers<[1], [0], [0], [1], [0, 0, 1, 1], [], []>} : vector<16x16xbf16>, vector<16x8xbf16>, vector<16x8xf32> -> vector<16x8xf32>
    %c0_16 = arith.constant 0 : index
    %c8 = arith.constant 8 : index
    %47 = vector.load %arg6[%c0_16, %c8] : memref<16x64xf32, #tpu.memory_space<vmem>>, vector<16x8xf32>
    tpu.vector_store %arg6[%c0_16, %c8], %46 {strides = array<i32>} : memref<16x64xf32, #tpu.memory_space<vmem>>, vector<16x8xf32>,
    %48 = vector.extract_strided_slice %3 {offsets = [0, 16], sizes = [16, 8], strides = [1, 1]} : vector<16x192xf32> to vector<16x8xf32>
    %cst_17 = arith.constant 0.353553385 : f32
    %49 = vector.broadcast %cst_17 : f32 to vector<16x8xf32>
    %50 = arith.mulf %48, %49 : vector<16x8xf32>
    %51 = arith.truncf %50 : vector<16x8xf32> to vector<16x8xbf16>
    %52 = vector.extract_strided_slice %3 {offsets = [0, 80], sizes = [16, 8], strides = [1, 1]} : vector<16x192xf32> to vector<16x8xf32>
    %53 = arith.truncf %52 : vector<16x8xf32> to vector<16x8xbf16>
    %54 = vector.extract_strided_slice %3 {offsets = [0, 144], sizes = [16, 8], strides = [1, 1]} : vector<16x192xf32> to vector<16x8xf32>
    %55 = arith.truncf %54 : vector<16x8xf32> to vector<16x8xbf16>
    %cst_18 = arith.constant dense<0.000000e+00> : vector<16x16xf32>
    %56 = tpu.matmul %51, %53, %cst_18 {dimension_numbers = #tpu.dot_dimension_numbers<[1], [1], [0], [0], [0, 0, 1, 0], [], []>} : vector<16x8xbf16>, vector<16x8xbf16>, vector<16x16xf32> -> vector<16x16xf32>
    %cst_19 = arith.constant dense<0xFF800000> : vector<16xf32>
    %57 = vector.multi_reduction <maximumf>, %56, %cst_19 [1] : vector<16x16xf32> to vector<16xf32>
    %58 = vector.shape_cast %57 : vector<16xf32> to vector<16x1xf32>
    %59 = vector.broadcast %58 : vector<16x1xf32> to vector<16x16xf32>
    %60 = arith.subf %56, %59 : vector<16x16xf32>
    %61 = math.exp %60 : vector<16x16xf32>
    %cst_20 = arith.constant dense<0.000000e+00> : vector<16xf32>
    %62 = vector.multi_reduction <add>, %61, %cst_20 [1] : vector<16x16xf32> to vector<16xf32>
    %63 = vector.shape_cast %62 : vector<16xf32> to vector<16x1xf32>
    %64 = tpu.reciprocal %63 {approx = true} : vector<16x1xf32> -> vector<16x1xf32>
    %65 = vector.broadcast %64 : vector<16x1xf32> to vector<16x16xf32>
    %66 = arith.mulf %61, %65 : vector<16x16xf32>
    %67 = arith.truncf %66 : vector<16x16xf32> to vector<16x16xbf16>
    %cst_21 = arith.constant dense<0.000000e+00> : vector<16x8xf32>
    %68 = tpu.matmul %67, %55, %cst_21 {dimension_numbers = #tpu.dot_dimension_numbers<[1], [0], [0], [1], [0, 0, 1, 1], [], []>} : vector<16x16xbf16>, vector<16x8xbf16>, vector<16x8xf32> -> vector<16x8xf32>
    %c0_22 = arith.constant 0 : index
    %c16 = arith.constant 16 : index
    %69 = vector.load %arg6[%c0_22, %c16] : memref<16x64xf32, #tpu.memory_space<vmem>>, vector<16x8xf32>
    tpu.vector_store %arg6[%c0_22, %c16], %68 {strides = array<i32>} : memref<16x64xf32, #tpu.memory_space<vmem>>, vector<16x8xf32>,
    %70 = vector.extract_strided_slice %3 {offsets = [0, 24], sizes = [16, 8], strides = [1, 1]} : vector<16x192xf32> to vector<16x8xf32>
    %cst_23 = arith.constant 0.353553385 : f32
    %71 = vector.broadcast %cst_23 : f32 to vector<16x8xf32>
    %72 = arith.mulf %70, %71 : vector<16x8xf32>
    %73 = arith.truncf %72 : vector<16x8xf32> to vector<16x8xbf16>
    %74 = vector.extract_strided_slice %3 {offsets = [0, 88], sizes = [16, 8], strides = [1, 1]} : vector<16x192xf32> to vector<16x8xf32>
    %75 = arith.truncf %74 : vector<16x8xf32> to vector<16x8xbf16>
    %76 = vector.extract_strided_slice %3 {offsets = [0, 152], sizes = [16, 8], strides = [1, 1]} : vector<16x192xf32> to vector<16x8xf32>
    %77 = arith.truncf %76 : vector<16x8xf32> to vector<16x8xbf16>
    %cst_24 = arith.constant dense<0.000000e+00> : vector<16x16xf32>
    %78 = tpu.matmul %73, %75, %cst_24 {dimension_numbers = #tpu.dot_dimension_numbers<[1], [1], [0], [0], [0, 0, 1, 0], [], []>} : vector<16x8xbf16>, vector<16x8xbf16>, vector<16x16xf32> -> vector<16x16xf32>
    %cst_25 = arith.constant dense<0xFF800000> : vector<16xf32>
    %79 = vector.multi_reduction <maximumf>, %78, %cst_25 [1] : vector<16x16xf32> to vector<16xf32>
    %80 = vector.shape_cast %79 : vector<16xf32> to vector<16x1xf32>
    %81 = vector.broadcast %80 : vector<16x1xf32> to vector<16x16xf32>
    %82 = arith.subf %78, %81 : vector<16x16xf32>
    %83 = math.exp %82 : vector<16x16xf32>
    %cst_26 = arith.constant dense<0.000000e+00> : vector<16xf32>
    %84 = vector.multi_reduction <add>, %83, %cst_26 [1] : vector<16x16xf32> to vector<16xf32>
    %85 = vector.shape_cast %84 : vector<16xf32> to vector<16x1xf32>
    %86 = tpu.reciprocal %85 {approx = true} : vector<16x1xf32> -> vector<16x1xf32>
    %87 = vector.broadcast %86 : vector<16x1xf32> to vector<16x16xf32>
    %88 = arith.mulf %83, %87 : vector<16x16xf32>
    %89 = arith.truncf %88 : vector<16x16xf32> to vector<16x16xbf16>
    %cst_27 = arith.constant dense<0.000000e+00> : vector<16x8xf32>
    %90 = tpu.matmul %89, %77, %cst_27 {dimension_numbers = #tpu.dot_dimension_numbers<[1], [0], [0], [1], [0, 0, 1, 1], [], []>} : vector<16x16xbf16>, vector<16x8xbf16>, vector<16x8xf32> -> vector<16x8xf32>
    %c0_28 = arith.constant 0 : index
    %c24 = arith.constant 24 : index
    %91 = vector.load %arg6[%c0_28, %c24] : memref<16x64xf32, #tpu.memory_space<vmem>>, vector<16x8xf32>
    tpu.vector_store %arg6[%c0_28, %c24], %90 {strides = array<i32>} : memref<16x64xf32, #tpu.memory_space<vmem>>, vector<16x8xf32>,
    %92 = vector.extract_strided_slice %3 {offsets = [0, 32], sizes = [16, 8], strides = [1, 1]} : vector<16x192xf32> to vector<16x8xf32>
    %cst_29 = arith.constant 0.353553385 : f32
    %93 = vector.broadcast %cst_29 : f32 to vector<16x8xf32>
    %94 = arith.mulf %92, %93 : vector<16x8xf32>
    %95 = arith.truncf %94 : vector<16x8xf32> to vector<16x8xbf16>
    %96 = vector.extract_strided_slice %3 {offsets = [0, 96], sizes = [16, 8], strides = [1, 1]} : vector<16x192xf32> to vector<16x8xf32>
    %97 = arith.truncf %96 : vector<16x8xf32> to vector<16x8xbf16>
    %98 = vector.extract_strided_slice %3 {offsets = [0, 160], sizes = [16, 8], strides = [1, 1]} : vector<16x192xf32> to vector<16x8xf32>
    %99 = arith.truncf %98 : vector<16x8xf32> to vector<16x8xbf16>
    %cst_30 = arith.constant dense<0.000000e+00> : vector<16x16xf32>
    %100 = tpu.matmul %95, %97, %cst_30 {dimension_numbers = #tpu.dot_dimension_numbers<[1], [1], [0], [0], [0, 0, 1, 0], [], []>} : vector<16x8xbf16>, vector<16x8xbf16>, vector<16x16xf32> -> vector<16x16xf32>
    %cst_31 = arith.constant dense<0xFF800000> : vector<16xf32>
    %101 = vector.multi_reduction <maximumf>, %100, %cst_31 [1] : vector<16x16xf32> to vector<16xf32>
    %102 = vector.shape_cast %101 : vector<16xf32> to vector<16x1xf32>
    %103 = vector.broadcast %102 : vector<16x1xf32> to vector<16x16xf32>
    %104 = arith.subf %100, %103 : vector<16x16xf32>
    %105 = math.exp %104 : vector<16x16xf32>
    %cst_32 = arith.constant dense<0.000000e+00> : vector<16xf32>
    %106 = vector.multi_reduction <add>, %105, %cst_32 [1] : vector<16x16xf32> to vector<16xf32>
    %107 = vector.shape_cast %106 : vector<16xf32> to vector<16x1xf32>
    %108 = tpu.reciprocal %107 {approx = true} : vector<16x1xf32> -> vector<16x1xf32>
    %109 = vector.broadcast %108 : vector<16x1xf32> to vector<16x16xf32>
    %110 = arith.mulf %105, %109 : vector<16x16xf32>
    %111 = arith.truncf %110 : vector<16x16xf32> to vector<16x16xbf16>
    %cst_33 = arith.constant dense<0.000000e+00> : vector<16x8xf32>
    %112 = tpu.matmul %111, %99, %cst_33 {dimension_numbers = #tpu.dot_dimension_numbers<[1], [0], [0], [1], [0, 0, 1, 1], [], []>} : vector<16x16xbf16>, vector<16x8xbf16>, vector<16x8xf32> -> vector<16x8xf32>
    %c0_34 = arith.constant 0 : index
    %c32 = arith.constant 32 : index
    %113 = vector.load %arg6[%c0_34, %c32] : memref<16x64xf32, #tpu.memory_space<vmem>>, vector<16x8xf32>
    tpu.vector_store %arg6[%c0_34, %c32], %112 {strides = array<i32>} : memref<16x64xf32, #tpu.memory_space<vmem>>, vector<16x8xf32>,
    %114 = vector.extract_strided_slice %3 {offsets = [0, 40], sizes = [16, 8], strides = [1, 1]} : vector<16x192xf32> to vector<16x8xf32>
    %cst_35 = arith.constant 0.353553385 : f32
    %115 = vector.broadcast %cst_35 : f32 to vector<16x8xf32>
    %116 = arith.mulf %114, %115 : vector<16x8xf32>
    %117 = arith.truncf %116 : vector<16x8xf32> to vector<16x8xbf16>
    %118 = vector.extract_strided_slice %3 {offsets = [0, 104], sizes = [16, 8], strides = [1, 1]} : vector<16x192xf32> to vector<16x8xf32>
    %119 = arith.truncf %118 : vector<16x8xf32> to vector<16x8xbf16>
    %120 = vector.extract_strided_slice %3 {offsets = [0, 168], sizes = [16, 8], strides = [1, 1]} : vector<16x192xf32> to vector<16x8xf32>
    %121 = arith.truncf %120 : vector<16x8xf32> to vector<16x8xbf16>
    %cst_36 = arith.constant dense<0.000000e+00> : vector<16x16xf32>
    %122 = tpu.matmul %117, %119, %cst_36 {dimension_numbers = #tpu.dot_dimension_numbers<[1], [1], [0], [0], [0, 0, 1, 0], [], []>} : vector<16x8xbf16>, vector<16x8xbf16>, vector<16x16xf32> -> vector<16x16xf32>
    %cst_37 = arith.constant dense<0xFF800000> : vector<16xf32>
    %123 = vector.multi_reduction <maximumf>, %122, %cst_37 [1] : vector<16x16xf32> to vector<16xf32>
    %124 = vector.shape_cast %123 : vector<16xf32> to vector<16x1xf32>
    %125 = vector.broadcast %124 : vector<16x1xf32> to vector<16x16xf32>
    %126 = arith.subf %122, %125 : vector<16x16xf32>
    %127 = math.exp %126 : vector<16x16xf32>
    %cst_38 = arith.constant dense<0.000000e+00> : vector<16xf32>
    %128 = vector.multi_reduction <add>, %127, %cst_38 [1] : vector<16x16xf32> to vector<16xf32>
    %129 = vector.shape_cast %128 : vector<16xf32> to vector<16x1xf32>
    %130 = tpu.reciprocal %129 {approx = true} : vector<16x1xf32> -> vector<16x1xf32>
    %131 = vector.broadcast %130 : vector<16x1xf32> to vector<16x16xf32>
    %132 = arith.mulf %127, %131 : vector<16x16xf32>
    %133 = arith.truncf %132 : vector<16x16xf32> to vector<16x16xbf16>
    %cst_39 = arith.constant dense<0.000000e+00> : vector<16x8xf32>
    %134 = tpu.matmul %133, %121, %cst_39 {dimension_numbers = #tpu.dot_dimension_numbers<[1], [0], [0], [1], [0, 0, 1, 1], [], []>} : vector<16x16xbf16>, vector<16x8xbf16>, vector<16x8xf32> -> vector<16x8xf32>
    %c0_40 = arith.constant 0 : index
    %c40 = arith.constant 40 : index
    %135 = vector.load %arg6[%c0_40, %c40] : memref<16x64xf32, #tpu.memory_space<vmem>>, vector<16x8xf32>
    tpu.vector_store %arg6[%c0_40, %c40], %134 {strides = array<i32>} : memref<16x64xf32, #tpu.memory_space<vmem>>, vector<16x8xf32>,
    %136 = vector.extract_strided_slice %3 {offsets = [0, 48], sizes = [16, 8], strides = [1, 1]} : vector<16x192xf32> to vector<16x8xf32>
    %cst_41 = arith.constant 0.353553385 : f32
    %137 = vector.broadcast %cst_41 : f32 to vector<16x8xf32>
    %138 = arith.mulf %136, %137 : vector<16x8xf32>
    %139 = arith.truncf %138 : vector<16x8xf32> to vector<16x8xbf16>
    %140 = vector.extract_strided_slice %3 {offsets = [0, 112], sizes = [16, 8], strides = [1, 1]} : vector<16x192xf32> to vector<16x8xf32>
    %141 = arith.truncf %140 : vector<16x8xf32> to vector<16x8xbf16>
    %142 = vector.extract_strided_slice %3 {offsets = [0, 176], sizes = [16, 8], strides = [1, 1]} : vector<16x192xf32> to vector<16x8xf32>
    %143 = arith.truncf %142 : vector<16x8xf32> to vector<16x8xbf16>
    %cst_42 = arith.constant dense<0.000000e+00> : vector<16x16xf32>
    %144 = tpu.matmul %139, %141, %cst_42 {dimension_numbers = #tpu.dot_dimension_numbers<[1], [1], [0], [0], [0, 0, 1, 0], [], []>} : vector<16x8xbf16>, vector<16x8xbf16>, vector<16x16xf32> -> vector<16x16xf32>
    %cst_43 = arith.constant dense<0xFF800000> : vector<16xf32>
    %145 = vector.multi_reduction <maximumf>, %144, %cst_43 [1] : vector<16x16xf32> to vector<16xf32>
    %146 = vector.shape_cast %145 : vector<16xf32> to vector<16x1xf32>
    %147 = vector.broadcast %146 : vector<16x1xf32> to vector<16x16xf32>
    %148 = arith.subf %144, %147 : vector<16x16xf32>
    %149 = math.exp %148 : vector<16x16xf32>
    %cst_44 = arith.constant dense<0.000000e+00> : vector<16xf32>
    %150 = vector.multi_reduction <add>, %149, %cst_44 [1] : vector<16x16xf32> to vector<16xf32>
    %151 = vector.shape_cast %150 : vector<16xf32> to vector<16x1xf32>
    %152 = tpu.reciprocal %151 {approx = true} : vector<16x1xf32> -> vector<16x1xf32>
    %153 = vector.broadcast %152 : vector<16x1xf32> to vector<16x16xf32>
    %154 = arith.mulf %149, %153 : vector<16x16xf32>
    %155 = arith.truncf %154 : vector<16x16xf32> to vector<16x16xbf16>
    %cst_45 = arith.constant dense<0.000000e+00> : vector<16x8xf32>
    %156 = tpu.matmul %155, %143, %cst_45 {dimension_numbers = #tpu.dot_dimension_numbers<[1], [0], [0], [1], [0, 0, 1, 1], [], []>} : vector<16x16xbf16>, vector<16x8xbf16>, vector<16x8xf32> -> vector<16x8xf32>
    %c0_46 = arith.constant 0 : index
    %c48 = arith.constant 48 : index
    %157 = vector.load %arg6[%c0_46, %c48] : memref<16x64xf32, #tpu.memory_space<vmem>>, vector<16x8xf32>
    tpu.vector_store %arg6[%c0_46, %c48], %156 {strides = array<i32>} : memref<16x64xf32, #tpu.memory_space<vmem>>, vector<16x8xf32>,
    %158 = vector.extract_strided_slice %3 {offsets = [0, 56], sizes = [16, 8], strides = [1, 1]} : vector<16x192xf32> to vector<16x8xf32>
    %cst_47 = arith.constant 0.353553385 : f32
    %159 = vector.broadcast %cst_47 : f32 to vector<16x8xf32>
    %160 = arith.mulf %158, %159 : vector<16x8xf32>
    %161 = arith.truncf %160 : vector<16x8xf32> to vector<16x8xbf16>
    %162 = vector.extract_strided_slice %3 {offsets = [0, 120], sizes = [16, 8], strides = [1, 1]} : vector<16x192xf32> to vector<16x8xf32>
    %163 = arith.truncf %162 : vector<16x8xf32> to vector<16x8xbf16>
    %164 = vector.extract_strided_slice %3 {offsets = [0, 184], sizes = [16, 8], strides = [1, 1]} : vector<16x192xf32> to vector<16x8xf32>
    %165 = arith.truncf %164 : vector<16x8xf32> to vector<16x8xbf16>
    %cst_48 = arith.constant dense<0.000000e+00> : vector<16x16xf32>
    %166 = tpu.matmul %161, %163, %cst_48 {dimension_numbers = #tpu.dot_dimension_numbers<[1], [1], [0], [0], [0, 0, 1, 0], [], []>} : vector<16x8xbf16>, vector<16x8xbf16>, vector<16x16xf32> -> vector<16x16xf32>
    %cst_49 = arith.constant dense<0xFF800000> : vector<16xf32>
    %167 = vector.multi_reduction <maximumf>, %166, %cst_49 [1] : vector<16x16xf32> to vector<16xf32>
    %168 = vector.shape_cast %167 : vector<16xf32> to vector<16x1xf32>
    %169 = vector.broadcast %168 : vector<16x1xf32> to vector<16x16xf32>
    %170 = arith.subf %166, %169 : vector<16x16xf32>
    %171 = math.exp %170 : vector<16x16xf32>
    %cst_50 = arith.constant dense<0.000000e+00> : vector<16xf32>
    %172 = vector.multi_reduction <add>, %171, %cst_50 [1] : vector<16x16xf32> to vector<16xf32>
    %173 = vector.shape_cast %172 : vector<16xf32> to vector<16x1xf32>
    %174 = tpu.reciprocal %173 {approx = true} : vector<16x1xf32> -> vector<16x1xf32>
    %175 = vector.broadcast %174 : vector<16x1xf32> to vector<16x16xf32>
    %176 = arith.mulf %171, %175 : vector<16x16xf32>
    %177 = arith.truncf %176 : vector<16x16xf32> to vector<16x16xbf16>
    %cst_51 = arith.constant dense<0.000000e+00> : vector<16x8xf32>
    %178 = tpu.matmul %177, %165, %cst_51 {dimension_numbers = #tpu.dot_dimension_numbers<[1], [0], [0], [1], [0, 0, 1, 1], [], []>} : vector<16x16xbf16>, vector<16x8xbf16>, vector<16x8xf32> -> vector<16x8xf32>
    %c0_52 = arith.constant 0 : index
    %c56 = arith.constant 56 : index
    %179 = vector.load %arg6[%c0_52, %c56] : memref<16x64xf32, #tpu.memory_space<vmem>>, vector<16x8xf32>
    tpu.vector_store %arg6[%c0_52, %c56], %178 {strides = array<i32>} : memref<16x64xf32, #tpu.memory_space<vmem>>, vector<16x8xf32>,
    %c0_53 = arith.constant 0 : index
    %c0_54 = arith.constant 0 : index
    %180 = vector.load %arg6[%c0_53, %c0_54] : memref<16x64xf32, #tpu.memory_space<vmem>>, vector<16x64xf32>
    %181 = arith.truncf %180 : vector<16x64xf32> to vector<16x64xbf16>
    %c0_55 = arith.constant 0 : index
    %c0_56 = arith.constant 0 : index
    %182 = vector.load %arg3[%c0_55, %c0_56] : memref<64x64xbf16, #tpu.memory_space<vmem>>, vector<64x64xbf16>
    %cst_57 = arith.constant dense<0.000000e+00> : vector<16x64xf32>
    %183 = tpu.matmul %181, %182, %cst_57 {dimension_numbers = #tpu.dot_dimension_numbers<[1], [0], [0], [1], [0, 0, 1, 1], [], []>} : vector<16x64xbf16>, vector<64x64xbf16>, vector<16x64xf32> -> vector<16x64xf32>
    %c0_58 = arith.constant 0 : index
    %c0_59 = arith.constant 0 : index
    %184 = vector.load %arg4[%c0_58, %c0_59] : memref<1x64xf32, #tpu.memory_space<vmem>>, vector<1x64xf32>
    %185 = vector.shape_cast %184 : vector<1x64xf32> to vector<64xf32>
    %186 = vector.shape_cast %185 : vector<64xf32> to vector<1x64xf32>
    %187 = vector.broadcast %186 : vector<1x64xf32> to vector<16x64xf32>
    %188 = arith.addf %183, %187 : vector<16x64xf32>
    %c0_60 = arith.constant 0 : index
    %c0_61 = arith.constant 0 : index
    %c0_62 = arith.constant 0 : index
    %189 = vector.load %arg5[%c0_60, %c0_61, %c0_62] : memref<1x16x64xf32, #tpu.memory_space<vmem>>, vector<1x16x64xf32>
    %190 = vector.shape_cast %189 : vector<1x16x64xf32> to vector<16x64xf32>
    %191 = vector.shape_cast %188 : vector<16x64xf32> to vector<1x16x64xf32>
    tpu.vector_store %arg5[%c0_60, %c0_61, %c0_62], %191 {strides = array<i32>} : memref<1x16x64xf32, #tpu.memory_space<vmem>>, vector<1x16x64xf32>,
    return
  }
  func.func @transform_0(%arg0: i32) -> (i32, i32, i32) {
    %c0_i32 = arith.constant 0 : i32
    %c0_i32_0 = arith.constant 0 : i32
    %c0_i32_1 = arith.constant 0 : i32
    return %arg0, %c0_i32, %c0_i32_0 : i32, i32, i32
  }
  func.func @transform_1(%arg0: i32) -> (i32, i32) {
    %c0_i32 = arith.constant 0 : i32
    %c0_i32_0 = arith.constant 0 : i32
    %c0_i32_1 = arith.constant 0 : i32
    return %c0_i32, %c0_i32_0 : i32, i32
  }
  func.func @transform_2(%arg0: i32) -> (i32, i32) {
    %c0_i32 = arith.constant 0 : i32
    %c0_i32_0 = arith.constant 0 : i32
    %c0_i32_1 = arith.constant 0 : i32
    return %c0_i32, %c0_i32_0 : i32, i32
  }
  func.func @transform_3(%arg0: i32) -> (i32, i32) {
    %c0_i32 = arith.constant 0 : i32
    %c0_i32_0 = arith.constant 0 : i32
    %c0_i32_1 = arith.constant 0 : i32
    return %c0_i32, %c0_i32_0 : i32, i32
  }
  func.func @transform_4(%arg0: i32) -> (i32, i32, i32) {
    %c0_i32 = arith.constant 0 : i32
    %c0_i32_0 = arith.constant 0 : i32
    %c0_i32_1 = arith.constant 0 : i32
    return %arg0, %c0_i32, %c0_i32_0 : i32, i32, i32
  }
}

</mosaic_0001>

<bundles_post_ra>
// kernel: tpu_custom_call.1
= control target key start
LH: loop header
LB: loop body
LE: loop exit
PB: predicated region body
PF: predicated region fallthrough
CT: control target
= control target key end

     0   :  { %9 = vsyncpa [#allocation4], 0  ;;  %s2676_s0 = inlined_call_operand.hbm [shape: bf16[2,16,64], index: 0, kind: input, shape index: {}]   ;;  %s2677_s1 = inlined_call_operand.hbm [shape: bf16[64,192], index: 1, kind: input, shape index: {}]   ;;  %s2678_s2 = inlined_call_operand.hbm [shape: bf16[64,64], index: 2, kind: input, shape index: {}]   ;;  %s2679_s3 = inlined_call_operand.vmem [shape: f32[1,64], index: 3, kind: input, shape index: {}]   ;;  %s2680_s4 = inlined_call_operand.hbm [shape: f32[2,16,64], index: 4, kind: output, shape index: {}]  }
   0x1   :  { %11 = vsyncpa [#allocation4 + $0x1], 0 }
   0x2   :  { %12 = vsyncpa [#allocation7], 0 }
   0x3   :  { %13 = vsyncpa [#allocation5], 0 }
   0x4   :  { %15 = vsyncpa [#allocation5 + $0x1], 0  ;;  %s2172_s15 = smov 0   ;;  %s2174_s16 = smov 0  }
   0x5   :  { %s2176_s17 = smov 0   ;;  %s2178_s18 = smov 0  }
   0x6 LB: > { %s2193_s19 = sadd.s32 4294967295, %s2118_s18   ;;  %s1594_s20 = sadd.s32 4294967294, %s2118_s18   ;;  %s2118_s18 = sphi %s2178_s18, %s2700_s18   ;;  %s2114_s17 = sphi %s2176_s17, %s2699_s17   ;;  %s2110_s16 = sphi %s2174_s16, %s2698_s16   ;;  %s2106_s15 = sphi %s2172_s15, %s2697_s15  }
   0x7   : > { %p41_p0 = scmp.ne.s32.totalorder %s2110_s16, %s2106_s15  ;;  %p2681_p1 = scmp.eq.s32.totalorder %s2193_s19, 0 }
   0x8   : > { %p134_p3 = scmp.eq.s32.totalorder %s1594_s20, 1  ;;  %p1595_p5 = scmp.ge.s32.totalorder %s2118_s18, 1 }
   0x9   : > { %p2202_p4 = por %p2681_p1, %p41_p0  ;;  %p141_p7 = scmp.lt.s32.totalorder %s2118_s18, 3 }
   0xa   : > { %p2207_p6 = por %p134_p3, %p41_p0  ;;  %s2120_s24 = smov [#allocation6]  }
   0xb   : > { %s2684_s21 = scalar_select %p2202_p4, 1, 0 }
   0xc   : > { %s2685_s22 = scalar_select %p2207_p6, 1, 0 }
   0xd   : > { %p2212_p8 = pnand %p1595_p5, %p141_p7  ;;  %s153_s25 = sshll.u32 %s2120_s24, 4  ;;  %s2216_s25 = int_to_ptr.vmem [resolvable:$true] %s153_s25 }
   0xe   : > { %s2121_s27 = smov [#allocation8]   ;;  %s1962_s5 = scalar_lea.hbm %s2677_s1, 1024 }
   0xf   : > { %p1803_p9 = pneg %p2212_p8  ;;  %s166_s28 = sshll.u32 %s2121_s27, 4  ;;  %s2227_s28 = int_to_ptr.vmem [resolvable:$true] %s166_s28 }
  0x10   : > { %p1963_p12 = scmp.ne.s32.totalorder %s2677_s1, %s1962_s5  ;;  %p1969_p5 = scmp.lt.u32.totalorder %s1962_s5, %s2677_s1 }
  0x11   : > { %p2223_p11 = pnand %p1803_p9, %p2681_p1 }
  0x13   : > { %p1964_p13 = pneg %p2223_p11 }
  0x15   : > { %p1965_p0 = pnand %p1964_p13, %p1963_p12 }
  0x17   : > { %p1966_p3 = pneg %p1965_p0 }
  0x19   : > { %p1971_p7 = pnand %p1969_p5, %p1966_p3 }
  0x1b   : > { %1974 = shalt.err (!%p1971_p7)
}
  0x1c   : > { %s1975_s10 = scalar_lea.vmem %s2216_s25, 1024  ;;  %p1983_p2 = scmp.lt.s32.totalorder %s2216_s25, %s2216_s25 }
  0x1d   : > { %p1976_p9 = scmp.ne.s32.totalorder %s2216_s25, %s1975_s10  ;;  %p1984_p12 = scmp.lt.s32.totalorder %s1975_s10, %s1975_s10 }
  0x1f   : > { %p1978_p10 = pnand %p1976_p9, %p1964_p13  ;;  %p1985_p0 = por %p1984_p12, %p1983_p2 }
  0x21   : > { %p1979_p1 = pneg %p1978_p10 }
  0x23   : > { %p1986_p6 = pnand %p1985_p0, %p1979_p1 }
  0x25   : > { %1989 = shalt.err (!%p1986_p6)
}
  0x26   : > { %s2122_s11 = smov 128   ;;  %s2123_s12 = smov 8  }
  0x27   : > { %1806 = dma.hbm_to_vmem [thread:$0]  (!%p2223_p11), %s2677_s1, 1024, %s2216_s25, [#allocation7], %s2122_s11, %s2122_s11, %s2123_s12  }
  0x28   : > { %s1990_s27 = scalar_lea.hbm %s2678_s2, 512 }
  0x29   : > { %p1991_p2 = scmp.ne.s32.totalorder %s2678_s2, %s1990_s27  ;;  %p1997_p10 = scmp.lt.u32.totalorder %s1990_s27, %s2678_s2 }
  0x2b   : > { %p1993_p1 = pnand %p1991_p2, %p1964_p13 }
  0x2d   : > { %p1994_p6 = pneg %p1993_p1 }
  0x2f   : > { %p1999_p3 = pnand %p1997_p10, %p1994_p6 }
  0x31   : > { %2002 = shalt.err (!%p1999_p3)
}
  0x32   : > { %s2003_s25 = scalar_lea.vmem %s2227_s28, 512  ;;  %p2011_p12 = scmp.lt.s32.totalorder %s2227_s28, %s2227_s28 }
  0x33   : > { %p2004_p5 = scmp.ne.s32.totalorder %s2227_s28, %s2003_s25  ;;  %p2012_p0 = scmp.lt.s32.totalorder %s2003_s25, %s2003_s25 }
  0x35   : > { %p2006_p7 = pnand %p2004_p5, %p1964_p13  ;;  %p2013_p2 = por %p2012_p0, %p2011_p12 }
  0x37   : > { %p2007_p9 = pneg %p2006_p7 }
  0x39   : > { %p2014_p1 = pnand %p2013_p2, %p2007_p9 }
  0x3b   : > { %2017 = shalt.err (!%p2014_p1)
}
  0x3c   : > { %s2124_s7 = smov 64   ;;  %s2125_s8 = smov 4  }
  0x3d   : > { %1809 = dma.hbm_to_vmem [thread:$0]  (!%p2223_p11), %s2678_s2, 512, %s2227_s28, [#allocation7], %s2124_s7, %s2124_s7, %s2125_s8  }
  0x3e   : > { %s2285_s11 = sadd.s32 1, %s2118_s18   ;;  %s28_s13 = sadd.s32 1, %s2114_s17 }
  0x3f   : > { %s25_s12 = ssub.s32 %s2118_s18, %s2285_s11  ;;  %p35_p6 = scmp.ne.s32.totalorder %s2114_s17, %s2110_s16 }
  0x40   : > { %p26_p13 = scmp.eq.s32.totalorder %s25_s12, 0  ;;  %p36_p10 = scmp.eq.s32.totalorder %s2118_s18, 0 }
  0x41   : > { %p2688_p5 = scmp.eq.s32.totalorder %s2193_s19, 1  ;;  %p1820_p9 = scmp.lt.s32.totalorder %s2118_s18, 2 }
  0x42   : > { %s2294_s14 = scalar_select %p26_p13, %s2114_s17, %s28_s13  }
  0x43   : > { %p37_p3 = por %p36_p10, %p35_p6  ;;  %p2298_p7 = por %p2688_p5, %p35_p6 }
  0x44   : > { %s183_s20 = sand.u32 1, %s2114_s17   ;;  %s1644_s28 = sshll.u32 %s2118_s18, 7 }
  0x45   : > { %s2689_s26 = scalar_select %p2298_p7, 1, 0 }
  0x46   : > { %s1599_s24 = sshll.u32 %s183_s20, 3  ;;  %s2308_s30 = scalar_lea.hbm %s2676_s0, %s1644_s28 }
  0x47   : > { %s187_s5 = scalar_lea.vmem [#allocation3], %s1599_s24  ;;  %p2312_p11 = pnand %p1820_p9, %p37_p3 }
  0x48   : > { %s194_s6 = sshll.u32 %s187_s5, 4  ;;  %s2316_s9 = scalar_lea.sflag [#allocation4], %s183_s20  ;;  %s2310_s6 = int_to_ptr.vmem [resolvable:$true] %s194_s6 }
  0x49   : > { %s2018_s10 = scalar_lea.hbm %s2308_s30, 128  ;;  %p2020_p0 = pneg %p2312_p11 }
  0x4a   : > { %p2019_p12 = scmp.ne.s32.totalorder %s2308_s30, %s2018_s10  ;;  %s2023_s24 = scalar_lea.hbm %s2676_s0, 256 }
  0x4b   : > { %p2024_p13 = scmp.lt.u32.totalorder %s2308_s30, %s2676_s0  ;;  %p2025_p6 = scmp.lt.u32.totalorder %s2023_s24, %s2018_s10 }
  0x4c   : > { %p2021_p2 = pnand %p2020_p0, %p2019_p12  ;;  %p2027_p3 = scmp.lt.u32.totalorder %s2018_s10, %s2308_s30 }
  0x4d   : > { %p2026_p10 = por %p2025_p6, %p2024_p13 }
  0x4e   : > { %p2022_p1 = pneg %p2021_p2 }
  0x4f   : > { %p2028_p5 = por %p2027_p3, %p2026_p10 }
  0x51   : > { %p2029_p9 = pnand %p2028_p5, %p2022_p1 }
  0x53   : > { %2032 = shalt.err (!%p2029_p9)
}
  0x54   : > { %s2033_s20 = scalar_lea.vmem %s2310_s6, 128  ;;  %s2126_s29 = smov [#allocation3]  }
  0x55   : > { %p2034_p12 = scmp.ne.s32.totalorder %s2310_s6, %s2033_s20  ;;  %s2038_s5 = sshll.u32 %s2126_s29, 4  ;;  %s2039_s5 = int_to_ptr.vmem [resolvable:$false] %s2038_s5 }
  0x56   : > { %s2040_s12 = scalar_lea.vmem %s2039_s5, 256  ;;  %p2041_p4 = scmp.lt.s32.totalorder %s2310_s6, %s2039_s5 }
  0x57   : > { %p2036_p2 = pnand %p2034_p12, %p2020_p0  ;;  %p2042_p13 = scmp.lt.s32.totalorder %s2040_s12, %s2033_s20 }
  0x59   : > { %p2037_p7 = pneg %p2036_p2  ;;  %p2043_p6 = por %p2042_p13, %p2041_p4 }
  0x5b   : > { %p2044_p10 = pnand %p2043_p6, %p2037_p7 }
  0x5d   : > { %2047 = shalt.err (!%p2044_p10)
}
  0x5e   : > { %1813 = dma.hbm_to_vmem [thread:$0]  (!%p2312_p11), %s2308_s30, 128, %s2310_s6, %s2316_s9, %s2124_s7, %s2124_s7, %s2125_s8  }
  0x5f   : > { %206 = sbr.rel (%p2212_p8) target bundleno = 2203 (0x89b), region = 36  ;;  %s2350_s10 = sand.u32 (!%p2212_p8), 1, %s2110_s16  }
  0x60   : > { %s1603_s13 = sshll.u32 (!%p2212_p8), %s2350_s10, 3  ;;  %s209_s24 = scalar_lea.sflag (!%p2212_p8), [#allocation4], %s2350_s10 }
  0x61   : > { %s212_s28 = scalar_lea.vmem (!%p2212_p8), [#allocation3], %s1603_s13  ;;  %p2691_p4 = scmp.ne.s32.totalorder (!%p2212_p8), %s2684_s21, 0 }
  0x66   : > { %2093 = dma.done.wait (%p2691_p4), %s209_s24, 128  }
  0x67   : > { %2095 = vsyncadd (%p2691_p4), %s209_s24, 4294967168  ;;  %p2692_p7 = scmp.eq.s32.totalorder %s2193_s19, 0 }
  0x69   : > { %2097 = dma.done.wait (%p2692_p7), [#allocation7], 1536   ;;  %p2693_p11 = pmov %p2692_p7 }
  0x6a   : > { %v2127_v0 = vmov 0   ;;  %v1881_v1 = vld [vmem:[#allocation6 + $0x4] ss:$8 sps:$4 sm:$0xff]   ;;  %v1883_v2 = vld [vmem:[#allocation6] ss:$8 sps:$4 sm:$0xff]   ;;  %v1893_v9 = vld [vmem:[%s212_s28] sm:$0xff]  }
  0x6b   : > { %2099 = vsyncadd (%p2693_p11), [#allocation7], 4294965760  ;;  %337 = vmatprep.mubr.bf16.mxu0 %v2127_v0  ;;  %305 = vmatprep.subr.bf16.mxu0 %v1881_v1  ;;  %v1884_v3 = vld [vmem:[#allocation6 + $0x14] ss:$8 sps:$4 sm:$0xff]   ;;  %v1886_v4 = vld [vmem:[#allocation6 + $0x10] ss:$8 sps:$4 sm:$0xff]  }
  0x6c   : > { %306 = vmatpush1.bf16.msra.mxu0 %v1883_v2  ;;  %v1887_v5 = vld [vmem:[#allocation6 + $0x24] ss:$8 sps:$4 sm:$0xff]   ;;  %v1889_v6 = vld [vmem:[#allocation6 + $0x20] ss:$8 sps:$4 sm:$0xff]   ;;  %v1890_v7 = vld [vmem:[#allocation6 + $0x34] ss:$8 sps:$4 sm:$0xff]  }
  0x6d   : > { %307 = vmatprep.subr.bf16.mxu0 %v1884_v3  ;;  %v1892_v8 = vld [vmem:[#allocation6 + $0x30] ss:$8 sps:$4 sm:$0xff]   ;;  %vm301_vm0 = vcmask 523264   ;;  %v2128_v10 = vmov 0.0   ;;  %vm2129_vm1 = vmmov 0   ;;  %s2130_s21 = smov 64  }
  0x6e   : > { %1683 = vmatprep.subr.bf16.mxu1 %v2128_v10  ;;  %1685 = vmatprep.mubr.msk.bf16.mxu1 %vm2129_vm1, %v2128_v10  ;;  %vm356_vm2 = vcmask 64512   ;;  %vm404_vm3 = vcmask 130048   ;;  %s2131_s23 = smov 56   ;;  %s2132_s7 = smov 112   ;;  %vm605_vm4 = vcmask 130112   ;;  %vm737_vm5 = vcmask 195712  }
  0x6f   : > { %s2133_s8 = smov 88   ;;  %s2134_s30 = smov 80   ;;  %vm869_vm6 = vcmask 261312   ;;  %vm1001_vm7 = vcmask 326912   ;;  %vm1133_vm8 = vcmask 392512   ;;  %vm1265_vm9 = vcmask 458112  }
  0x70   : > { %308 = vmatpush1.bf16.msra.mxu0 %v1886_v4  ;;  %s2135_s6 = smov 72   ;;  %s2136_s25 = smov 120   ;;  %vm1397_vm10 = vcmask 523712  }
  0x71   : > { %309 = vmatprep.subr.bf16.mxu0 %v1887_v5  ;;  %s2137_s9 = smov 48   ;;  %s2138_s27 = smov 40  }
  0x72   : > { %s2139_s20 = smov 104   ;;  %s2140_s29 = smov 32  }
  0x73   : > { %s2141_s5 = smov 96   ;;  %s2142_s12 = smov 24  }
  0x74   : > { %310 = vmatpush1.bf16.msra.mxu0 %v1889_v6  ;;  %s2143_s13 = smov 16   ;;  %s2144_s24 = smov 8  }
  0x75   : > { %311 = vmatprep.subr.bf16.mxu0 %v1890_v7  ;;  %s1606_s28 = sshll.u32 %s2350_s10, 4  ;;  %p2694_p0 = scmp.ne.s32.totalorder %s2689_s26, 0 }
  0x78   : > { %312 = vmatpush1.bf16.msra.mxu0 %v1892_v8 }
  0x79   : > { %1707 = vmatprep.subr.bf16.mxu0 %v2128_v10 }
  0x7b   : > { %1616 = vmatmul.mubr.msk.bf16.vlgmr.msra.gmra.mrb[0].mxu0 %vm301_vm0, %v1893_v9 }
  0x7c   : > { %1709 = vmatprep.mubr.msk.bf16.mxu0 %vm2129_vm1, %v2128_v10 }
 0x14e   : > { %v339_v11 = vpop.f32.mrb[0].mxu0 }
 0x14f   : > { %v341_v12 = vpop.f32.mrb[1].mxu0  ;;  %v348_v14 = vmul.f32 0.35355338, %v339_v11 }
 0x150   : > { %v343_v13 = vpop.f32.mrb[2].mxu0 }
 0x151   : > { %v349_v15 = vmul.f32 0.35355338, %v343_v13  ;;  %v2369_v16 = vpack.c.bf16 %v343_v13, %v339_v11  ;;  %v345_v17 = vpop.f32.mrb[3].mxu0 }
 0x152   : > { %v2371_v18 = vpack.c.bf16 %v345_v17, %v341_v12 }
 0x153   : > { %v350_v19 = vpack.c.bf16 %v349_v15, %v348_v14  ;;  %354 = vrot.lane.b32.xlu0 %v2369_v16, %s2130_s21 }
 0x1c5   : > { %v355_v20 = vpop.permute.xlu0 %354 }
 0x1c6   : > { %v361_v21 = vsel %vm356_vm2, %v355_v20, 0 }
 0x1c7   : > { %1684 = vmatpush3.bf16.xpose.msra.mxu1 %v361_v21 }
 0x1c8   : > { %1689 = vmatprep.subr.bf16.mxu1 %v2128_v10 }
 0x1ce   : > { %1686 = vmatmul.mubr.msk.bf16.vlgmr.msra.gmra.mrb[0].mxu1 %vm356_vm2, %v350_v19 }
 0x1cf   : > { %1690 = vmatpush3.bf16.msra.mxu1 %v2371_v18  ;;  %1691 = vmatprep.mubr.msk.bf16.mxu1 %vm2129_vm1, %v2128_v10 }
 0x1d0   : > { %1695 = vmatprep.subr.bf16.mxu1 %v2128_v10 }
 0x2a1   : > { %v397_v22 = vpop.f32.mrb[0].mxu1 }
 0x2a2   : > { %v1687_v23 = vpop.f32.mrb[1].mxu1  ;;  %v405_v24 = vsel %vm404_vm3, %v397_v22, -inf }
 0x2a3   : > { %406 = vmax.xlane.f32.xlu0 %v405_v24  ;;  %v400_v25 = vpop.f32.mrb[2].mxu1 }
 0x2a4   : > { %v1688_v26 = vpop.f32.mrb[3].mxu1  ;;  %v408_v27 = vsel %vm404_vm3, %v400_v25, -inf }
 0x2a5   : > { %409 = vmax.xlane.f32.xlu1 %v408_v27 }
 0x2b6   : > { %477 = vrot.lane.b32.xlu1 %v2369_v16, %s2131_s23 }
 0x2b9   : > { %608 = vrot.lane.b32.xlu0 %v350_v19, %s2132_s7 }
 0x2bd   : > { %1004 = vrot.lane.b32.xlu0 %v350_v19, %s2133_s8 }
 0x2c1   : > { %1136 = vrot.lane.b32.xlu0 %v350_v19, %s2134_s30 }
 0x2c5   : > { %1268 = vrot.lane.b32.xlu0 %v350_v19, %s2135_s6 }
 0x330   : > { %v407_v28 = vpop.xlane.xlu0 %406 }
 0x331   : > { %v411_v29 = vsub.f32 %v397_v22, %v407_v28 }
 0x332   : > { %v410_v30 = vpop.xlane.xlu1 %409 }
 0x333   : > { %v413_v31 = vmul.f32 1.442695, %v411_v29  ;;  %v412_v32 = vsub.f32 %v400_v25, %v410_v30 }
 0x334   : > { %v609_v50 = vpop.permute.xlu0 %608 }
 0x335   : > { %1898 = vpow2.f32 %v413_v31  ;;  %v415_v33 = vmul.f32 1.442695, %v412_v32 }
 0x336   : > { %v478_v38 = vpop.permute.xlu1 %477 }
 0x337   : > { %1900 = vpow2.f32 %v415_v33  ;;  %v483_v51 = vsel %vm356_vm2, %v478_v38, 0 }
 0x338   : > { %v1005_v60 = vpop.permute.xlu0 %1004 }
 0x33c   : > { %v1137_v63 = vpop.permute.xlu0 %1136 }
 0x33f   : > { %v1899_v34 = vpop.eup %1898 }
 0x340   : > { %v417_v35 = vsel %vm404_vm3, %v1899_v34, 0.0  ;;  %v1269_v1 = vpop.permute.xlu0 %1268 }
 0x341   : > { %v1901_v36 = vpop.eup %1900  ;;  %418 = vadd.xlane.f32.xlu1 %v417_v35 }
 0x342   : > { %v420_v37 = vsel %vm404_vm3, %v1901_v36, 0.0 }
 0x345   : > { %421 = vadd.xlane.f32.xlu1 %v420_v37 }
 0x356   : > { %475 = vrot.lane.b32.xlu1 %v350_v19, %s2136_s25 }
 0x35a   : > { %610 = vrot.lane.b32.xlu1 %v2369_v16, %s2137_s9 }
 0x35e   : > { %742 = vrot.lane.b32.xlu1 %v2369_v16, %s2138_s27 }
 0x362   : > { %740 = vrot.lane.b32.xlu1 %v350_v19, %s2139_s20 }
 0x366   : > { %874 = vrot.lane.b32.xlu1 %v2369_v16, %s2140_s29 }
 0x36a   : > { %872 = vrot.lane.b32.xlu1 %v350_v19, %s2141_s5 }
 0x36e   : > { %1006 = vrot.lane.b32.xlu1 %v2369_v16, %s2142_s12 }
 0x372   : > { %1138 = vrot.lane.b32.xlu1 %v2369_v16, %s2143_s13 }
 0x376   : > { %1270 = vrot.lane.b32.xlu1 %v2369_v16, %s2144_s24 }
 0x3ce   : > { %v419_v39 = vpop.xlane.xlu1 %418 }
 0x3cf   : > { %1902 = vrcp.f32 %v419_v39 }
 0x3d2   : > { %v422_v40 = vpop.xlane.xlu1 %421 }
 0x3d3   : > { %1904 = vrcp.f32 %v422_v40 }
 0x3d6   : > { %v476_v41 = vpop.permute.xlu1 %475 }
 0x3d9   : > { %v1903_v43 = vpop.eup %1902 }
 0x3da   : > { %v611_v42 = vpop.permute.xlu1 %610  ;;  %v425_v46 = vmul.f32 %v1903_v43, %v1899_v34 }
 0x3db   : > { %v616_v44 = vsel %vm356_vm2, %v611_v42, 0 }
 0x3dc   : > { %1708 = vmatpush3.bf16.xpose.msra.mxu0 %v616_v44 }
 0x3dd   : > { %v1905_v45 = vpop.eup %1904  ;;  %1719 = vmatprep.subr.bf16.mxu0 %v2128_v10 }
 0x3de   : > { %v426_v47 = vmul.f32 %v1905_v45, %v1901_v36  ;;  %v743_v48 = vpop.permute.xlu1 %742 }
 0x3df   : > { %v748_v53 = vsel %vm356_vm2, %v743_v48, 0 }
 0x3e0   : > { %v427_v49 = vpack.c.bf16 %v426_v47, %v425_v46 }
 0x3e2   : > { %v741_v52 = vpop.permute.xlu1 %740  ;;  %1692 = vmatmul.mubr.msk.bf16.vlgmr.msra.gmra.mrb[4].mxu1 %vm404_vm3, %v427_v49 }
 0x3e3   : > { %1696 = vmatpush3.bf16.xpose.msra.mxu1 %v483_v51  ;;  %1710 = vmatmul.mubr.msk.bf16.vlgmr.msra.gmra.mrb[4].mxu0 %vm356_vm2, %v609_v50 }
 0x3e4   : > { %1720 = vmatpush3.bf16.xpose.msra.mxu0 %v748_v53  ;;  %1697 = vmatprep.mubr.msk.bf16.mxu1 %vm2129_vm1, %v2128_v10 }
 0x3e5   : > { %1721 = vmatprep.mubr.msk.bf16.mxu0 %vm2129_vm1, %v2128_v10  ;;  %1731 = vmatprep.subr.bf16.mxu0 %v2128_v10 }
 0x3e6   : > { %v875_v54 = vpop.permute.xlu1 %874  ;;  %1701 = vmatprep.subr.bf16.mxu1 %v2128_v10 }
 0x3e7   : > { %v880_v56 = vsel %vm356_vm2, %v875_v54, 0 }
 0x3ea   : > { %v873_v55 = vpop.permute.xlu1 %872  ;;  %1698 = vmatmul.mubr.msk.bf16.vlgmr.msra.gmra.mrb[8].mxu1 %vm356_vm2, %v476_v41 }
 0x3eb   : > { %1722 = vmatmul.mubr.msk.bf16.vlgmr.msra.gmra.mrb[8].mxu0 %vm356_vm2, %v741_v52  ;;  %1703 = vmatprep.mubr.msk.bf16.mxu1 %vm2129_vm1, %v2128_v10 }
 0x3ec   : > { %1732 = vmatpush3.bf16.xpose.msra.mxu0 %v880_v56  ;;  %1733 = vmatprep.mubr.msk.bf16.mxu0 %vm2129_vm1, %v2128_v10 }
 0x3ed   : > { %1743 = vmatprep.subr.bf16.mxu0 %v2128_v10 }
 0x3ee   : > { %v1007_v57 = vpop.permute.xlu1 %1006 }
 0x3ef   : > { %v1012_v58 = vsel %vm356_vm2, %v1007_v57, 0 }
 0x3f2   : > { %v1139_v59 = vpop.permute.xlu1 %1138 }
 0x3f3   : > { %1734 = vmatmul.mubr.msk.bf16.vlgmr.msra.gmra.mrb[12].mxu0 %vm356_vm2, %v873_v55  ;;  %v1144_v61 = vsel %vm356_vm2, %v1139_v59, 0 }
 0x3f4   : > { %1744 = vmatpush3.bf16.xpose.msra.mxu0 %v1012_v58  ;;  %1745 = vmatprep.mubr.msk.bf16.mxu0 %vm2129_vm1, %v2128_v10 }
 0x3f5   : > { %1755 = vmatprep.subr.bf16.mxu0 %v2128_v10 }
 0x3f6   : > { %v1271_v62 = vpop.permute.xlu1 %1270 }
 0x3f7   : > { %v1276_v0 = vsel %vm356_vm2, %v1271_v62, 0 }
 0x3fb   : > { %1746 = vmatmul.mubr.msk.bf16.vlgmr.msra.gmra.mrb[16].mxu0 %vm356_vm2, %v1005_v60 }
 0x3fc   : > { %1756 = vmatpush3.bf16.xpose.msra.mxu0 %v1144_v61  ;;  %1757 = vmatprep.mubr.msk.bf16.mxu0 %vm2129_vm1, %v2128_v10 }
 0x3fd   : > { %1767 = vmatprep.subr.bf16.mxu0 %v2128_v10 }
 0x403   : > { %1758 = vmatmul.mubr.msk.bf16.vlgmr.msra.gmra.mrb[20].mxu0 %vm356_vm2, %v1137_v63 }
 0x404   : > { %1768 = vmatpush3.bf16.xpose.msra.mxu0 %v1276_v0  ;;  %1769 = vmatprep.mubr.msk.bf16.mxu0 %vm2129_vm1, %v2128_v10 }
 0x405   : > { %1779 = vmatprep.subr.bf16.mxu0 %v2128_v10 }
 0x40b   : > { %1770 = vmatmul.mubr.msk.bf16.vlgmr.msra.gmra.mrb[24].mxu0 %vm356_vm2, %v1269_v1 }
 0x40c   : > { %1787 = vmatprep.mubr.msk.bf16.mxu0 %vm2129_vm1, %v2128_v10 }
 0x4b5   : > { %v465_v2 = vpop.f32.mrb[4].mxu1 }
 0x4b6   : > { %472 = vst.msk [vmem:[#allocation2] sm:$0xff] %vm356_vm2, %v465_v2  ;;  %v1693_v3 = vpop.f32.mrb[5].mxu1  ;;  %v2445_v4 = vpop.f32.mrb[4].mxu0 }
 0x4b7   : > { %v468_v5 = vpop.f32.mrb[6].mxu1  ;;  %v1711_v6 = vpop.f32.mrb[5].mxu0  ;;  %v659_v23 = vsel %vm404_vm3, %v2445_v4, -inf }
 0x4b8   : > { %473 = vst.msk [vmem:[#allocation2 + $0x8] sm:$0xff] %vm356_vm2, %v468_v5  ;;  %v1694_v7 = vpop.f32.mrb[7].mxu1  ;;  %v655_v8 = vpop.f32.mrb[6].mxu0 }
 0x4b9   : > { %v1712_v9 = vpop.f32.mrb[7].mxu0  ;;  %v662_v22 = vsel %vm404_vm3, %v655_v8, -inf }
 0x4bd   : > { %v2448_v11 = vpop.f32.mrb[8].mxu1 }
 0x4be   : > { %v1699_v12 = vpop.f32.mrb[9].mxu1  ;;  %v2450_v13 = vpop.f32.mrb[8].mxu0  ;;  %v526_v14 = vsel %vm404_vm3, %v2448_v11, -inf }
 0x4bf   : > { %v1723_v15 = vpop.f32.mrb[9].mxu0  ;;  %527 = vmax.xlane.f32.xlu1 %v526_v14  ;;  %v2454_v16 = vpop.f32.mrb[10].mxu1  ;;  %v791_v28 = vsel %vm404_vm3, %v2450_v13, -inf }
 0x4c0   : > { %v1700_v17 = vpop.f32.mrb[11].mxu1  ;;  %v787_v19 = vpop.f32.mrb[10].mxu0  ;;  %v529_v20 = vsel %vm404_vm3, %v2454_v16, -inf }
 0x4c1   : > { %v1724_v21 = vpop.f32.mrb[11].mxu0  ;;  %530 = vmax.xlane.f32.xlu0 %v529_v20  ;;  %v794_v25 = vsel %vm404_vm3, %v787_v19, -inf }
 0x4c3   : > { %663 = vmax.xlane.f32.xlu1 %v662_v22 }
 0x4c5   : > { %660 = vmax.xlane.f32.xlu0 %v659_v23 }
 0x4c6   : > { %v916_v24 = vpop.f32.mrb[12].mxu0 }
 0x4c7   : > { %v1735_v26 = vpop.f32.mrb[13].mxu0  ;;  %795 = vmax.xlane.f32.xlu1 %v794_v25  ;;  %v923_v31 = vsel %vm404_vm3, %v916_v24, -inf }
 0x4c8   : > { %v919_v27 = vpop.f32.mrb[14].mxu0 }
 0x4c9   : > { %v1736_v29 = vpop.f32.mrb[15].mxu0  ;;  %792 = vmax.xlane.f32.xlu0 %v791_v28  ;;  %v926_v30 = vsel %vm404_vm3, %v919_v27, -inf }
 0x4cb   : > { %927 = vmax.xlane.f32.xlu1 %v926_v30 }
 0x4cd   : > { %924 = vmax.xlane.f32.xlu0 %v923_v31 }
 0x4ce   : > { %v1048_v32 = vpop.f32.mrb[16].mxu0 }
 0x4cf   : > { %v1747_v33 = vpop.f32.mrb[17].mxu0  ;;  %v1055_v34 = vsel %vm404_vm3, %v1048_v32, -inf }
 0x4d0   : > { %v1051_v35 = vpop.f32.mrb[18].mxu0 }
 0x4d1   : > { %v1748_v36 = vpop.f32.mrb[19].mxu0  ;;  %1056 = vmax.xlane.f32.xlu0 %v1055_v34  ;;  %v1058_v37 = vsel %vm404_vm3, %v1051_v35, -inf }
 0x4d2   : > { %1059 = vmax.xlane.f32.xlu1 %v1058_v37 }
 0x4d6   : > { %v2468_v38 = vpop.f32.mrb[20].mxu0 }
 0x4d7   : > { %v1759_v39 = vpop.f32.mrb[21].mxu0  ;;  %v1187_v40 = vsel %vm404_vm3, %v2468_v38, -inf }
 0x4d8   : > { %v2472_v41 = vpop.f32.mrb[22].mxu0  ;;  %1188 = vmax.xlane.f32.xlu0 %v1187_v40 }
 0x4d9   : > { %v1760_v42 = vpop.f32.mrb[23].mxu0  ;;  %v1190_v43 = vsel %vm404_vm3, %v2472_v41, -inf }
 0x4da   : > { %1191 = vmax.xlane.f32.xlu1 %v1190_v43 }
 0x4de   : > { %v2476_v44 = vpop.f32.mrb[24].mxu0 }
 0x4df   : > { %v1771_v45 = vpop.f32.mrb[25].mxu0  ;;  %v1319_v46 = vsel %vm404_vm3, %v2476_v44, -inf }
 0x4e0   : > { %v2480_v47 = vpop.f32.mrb[26].mxu0  ;;  %1320 = vmax.xlane.f32.xlu0 %v1319_v46 }
 0x4e1   : > { %v1772_v48 = vpop.f32.mrb[27].mxu0  ;;  %v1322_v49 = vsel %vm404_vm3, %v2480_v47, -inf }
 0x4e2   : > { %1323 = vmax.xlane.f32.xlu1 %v1322_v49 }
 0x54c   : > { %v528_v50 = vpop.xlane.xlu1 %527 }
 0x54d   : > { %v532_v0 = vsub.f32 %v2448_v11, %v528_v50 }
 0x54e   : > { %v531_v51 = vpop.xlane.xlu0 %530 }
 0x54f   : > { %v533_v17 = vsub.f32 %v2454_v16, %v531_v51 }
 0x550   : > { %v664_v52 = vpop.xlane.xlu1 %663 }
 0x551   : > { %v666_v53 = vsub.f32 %v655_v8, %v664_v52  ;;  %v536_v25 = vmul.f32 1.442695, %v533_v17 }
 0x552   : > { %v661_v54 = vpop.xlane.xlu0 %660 }
 0x553   : > { %v669_v55 = vmul.f32 1.442695, %v666_v53  ;;  %v665_v56 = vsub.f32 %v2445_v4, %v661_v54  ;;  %v534_v4 = vmul.f32 1.442695, %v532_v0 }
 0x554   : > { %v796_v57 = vpop.xlane.xlu1 %795 }
 0x555   : > { %1906 = vpow2.f32 %v669_v55  ;;  %v667_v58 = vmul.f32 1.442695, %v665_v56  ;;  %v798_v59 = vsub.f32 %v787_v19, %v796_v57 }
 0x556   : > { %v793_v60 = vpop.xlane.xlu0 %792 }
 0x557   : > { %1908 = vpow2.f32 %v667_v58  ;;  %v801_v61 = vmul.f32 1.442695, %v798_v59  ;;  %v797_v62 = vsub.f32 %v2450_v13, %v793_v60 }
 0x558   : > { %v928_v63 = vpop.xlane.xlu1 %927 }
 0x559   : > { %1910 = vpow2.f32 %v801_v61  ;;  %v799_v1 = vmul.f32 1.442695, %v797_v62  ;;  %v930_v2 = vsub.f32 %v919_v27, %v928_v63 }
 0x55a   : > { %v925_v3 = vpop.xlane.xlu0 %924 }
 0x55b   : > { %1912 = vpow2.f32 %v799_v1  ;;  %v933_v5 = vmul.f32 1.442695, %v930_v2  ;;  %v929_v6 = vsub.f32 %v916_v24, %v925_v3 }
 0x55d   : > { %1914 = vpow2.f32 %v933_v5  ;;  %v931_v7 = vmul.f32 1.442695, %v929_v6 }
 0x55e   : > { %v1057_v8 = vpop.xlane.xlu0 %1056 }
 0x55f   : > { %v2487_v9 = vpop.eup %1906  ;;  %1916 = vpow2.f32 %v931_v7  ;;  %v1061_v12 = vsub.f32 %v1048_v32, %v1057_v8  ;;  %v1060_v14 = vpop.xlane.xlu1 %1059 }
 0x560   : > { %v1062_v13 = vsub.f32 %v1051_v35, %v1060_v14  ;;  %v674_v11 = vsel %vm404_vm3, %v2487_v9, 0.0  ;;  %1918 = vpow2.f32 %v534_v4 }
 0x561   : > { %v2491_v15 = vpop.eup %1908  ;;  %v1063_v19 = vmul.f32 1.442695, %v1061_v12  ;;  %675 = vadd.xlane.f32.xlu1 %v674_v11 }
 0x562   : > { %v1065_v20 = vmul.f32 1.442695, %v1062_v13  ;;  %v671_v21 = vsel %vm404_vm3, %v2491_v15, 0.0 }
 0x563   : > { %v2496_v22 = vpop.eup %1910  ;;  %1920 = vpow2.f32 %v1063_v19  ;;  %672 = vadd.xlane.f32.xlu0 %v671_v21 }
 0x564   : > { %v806_v23 = vsel %vm404_vm3, %v2496_v22, 0.0  ;;  %1922 = vpow2.f32 %v1065_v20 }
 0x565   : > { %v2500_v24 = vpop.eup %1912  ;;  %807 = vadd.xlane.f32.xlu1 %v806_v23  ;;  %1924 = vpow2.f32 %v536_v25  ;;  %v1189_v39 = vpop.xlane.xlu0 %1188 }
 0x566   : > { %v803_v16 = vsel %vm404_vm3, %v2500_v24, 0.0  ;;  %v1193_v40 = vsub.f32 %v2468_v38, %v1189_v39 }
 0x567   : > { %v2504_v26 = vpop.eup %1914  ;;  %804 = vadd.xlane.f32.xlu0 %v803_v16  ;;  %v1192_v43 = vpop.xlane.xlu1 %1191 }
 0x568   : > { %v938_v27 = vsel %vm404_vm3, %v2504_v26, 0.0  ;;  %v1195_v42 = vmul.f32 1.442695, %v1193_v40  ;;  %v1194_v45 = vsub.f32 %v2472_v41, %v1192_v43 }
 0x569   : > { %v2508_v28 = vpop.eup %1916  ;;  %939 = vadd.xlane.f32.xlu1 %v938_v27 }
 0x56a   : > { %v935_v29 = vsel %vm404_vm3, %v2508_v28, 0.0  ;;  %v2512_v30 = vpop.eup %1918  ;;  %1926 = vpow2.f32 %v1195_v42  ;;  %v1197_v48 = vmul.f32 1.442695, %v1194_v45 }
 0x56b   : > { %936 = vadd.xlane.f32.xlu0 %v935_v29  ;;  %v538_v32 = vsel %vm404_vm3, %v2512_v30, 0.0 }
 0x56c   : > { %1928 = vpow2.f32 %v1197_v48 }
 0x56d   : > { %v2514_v31 = vpop.eup %1920  ;;  %v1321_v46 = vpop.xlane.xlu0 %1320 }
 0x56e   : > { %v1067_v33 = vsel %vm404_vm3, %v2514_v31, 0.0  ;;  %v2520_v34 = vpop.eup %1922  ;;  %v1325_v49 = vsub.f32 %v2476_v44, %v1321_v46 }
 0x56f   : > { %539 = vadd.xlane.f32.xlu0 %v538_v32  ;;  %1068 = vadd.xlane.f32.xlu1 %v1067_v33  ;;  %v1070_v35 = vsel %vm404_vm3, %v2520_v34, 0.0  ;;  %v2524_v36 = vpop.eup %1924  ;;  %v1324_v50 = vpop.xlane.xlu1 %1323 }
 0x570   : > { %v541_v37 = vsel %vm404_vm3, %v2524_v36, 0.0  ;;  %v1327_v51 = vmul.f32 1.442695, %v1325_v49  ;;  %v1326_v52 = vsub.f32 %v2480_v47, %v1324_v50 }
 0x572   : > { %1930 = vpow2.f32 %v1327_v51  ;;  %v1329_v54 = vmul.f32 1.442695, %v1326_v52 }
 0x573   : > { %1071 = vadd.xlane.f32.xlu1 %v1070_v35 }
 0x574   : > { %v2536_v53 = vpop.eup %1926  ;;  %1932 = vpow2.f32 %v1329_v54 }
 0x575   : > { %v1199_v38 = vsel %vm404_vm3, %v2536_v53, 0.0 }
 0x576   : > { %v2540_v55 = vpop.eup %1928 }
 0x577   : > { %542 = vadd.xlane.f32.xlu1 %v541_v37  ;;  %v1202_v41 = vsel %vm404_vm3, %v2540_v55, 0.0 }
 0x57c   : > { %v2544_v44 = vpop.eup %1930 }
 0x57d   : > { %v1331_v47 = vsel %vm404_vm3, %v2544_v44, 0.0 }
 0x57e   : > { %v2548_v56 = vpop.eup %1932 }
 0x57f   : > { %v1334_v57 = vsel %vm404_vm3, %v2548_v56, 0.0 }
 0x585   : > { %550 = vrot.lane.b32.xlu0 %v2371_v18, %s2136_s25 }
 0x588   : > { %682 = vrot.lane.b32.xlu1 %v2371_v18, %s2132_s7  ;;  %s244_s7 = scalar_lea.vmem [#allocation9], %s1606_s28 }
 0x5a4   : > { %1200 = vadd.xlane.f32.xlu0 %v1199_v38 }
 0x5ac   : > { %1203 = vadd.xlane.f32.xlu1 %v1202_v41 }
 0x5b0   : > { %1332 = vadd.xlane.f32.xlu1 %v1331_v47 }
 0x5b4   : > { %1335 = vadd.xlane.f32.xlu1 %v1334_v57 }
 0x5ba   : > { %814 = vrot.lane.b32.xlu0 %v2371_v18, %s2139_s20  ;;  %s2145_s20 = smov [#allocation9]  }
 0x5be   : > { %1078 = vrot.lane.b32.xlu0 %v2371_v18, %s2133_s8  ;;  %s1502_s8 = sshll.u32 %s244_s7, 4  ;;  %s2624_s8 = int_to_ptr.vmem [resolvable:$true] %s1502_s8 }
 0x5c2   : > { %1210 = vrot.lane.b32.xlu0 %v2371_v18, %s2134_s30  ;;  %s1645_s30 = sshll.u32 %s2193_s19, 8  ;;  %s1489_s19 = scalar_lea.sflag [#allocation5], %s2350_s10 }
 0x5c5   : > { %946 = vrot.lane.b32.xlu1 %v2371_v18, %s2141_s5 }
 0x5c6   : > { %1342 = vrot.lane.b32.xlu0 %v2371_v18, %s2135_s6 }
 0x5ee   : > { %v676_v58 = vpop.xlane.xlu1 %675 }
 0x5f0   : > { %v673_v59 = vpop.xlane.xlu0 %672 }
 0x5f2   : > { %v808_v60 = vpop.xlane.xlu1 %807 }
 0x5f4   : > { %v805_v61 = vpop.xlane.xlu0 %804 }
 0x5f6   : > { %v940_v62 = vpop.xlane.xlu1 %939 }
 0x5f7   : > { %1934 = vrcp.f32 %v940_v62 }
 0x5f8   : > { %v937_v63 = vpop.xlane.xlu0 %936 }
 0x5f9   : > { %1936 = vrcp.f32 %v937_v63 }
 0x5fc   : > { %v1069_v0 = vpop.xlane.xlu1 %1068  ;;  %v540_v1 = vpop.xlane.xlu0 %539 }
 0x5fd   : > { %1938 = vrcp.f32 %v1069_v0 }
 0x600   : > { %v1072_v2 = vpop.xlane.xlu1 %1071  ;;  %v551_v3 = vpop.permute.xlu0 %550 }
 0x601   : > { %v1935_v5 = vpop.eup %1934  ;;  %1940 = vrcp.f32 %v1072_v2  ;;  %1702 = vmatpush3.bf16.msra.mxu1 %v551_v3  ;;  %v1894_v3 = vld [vmem:[#allocation8] sm:$0xff]  }
 0x602   : > { %1713 = vmatprep.subr.bf16.mxu1 %v2128_v10  ;;  %1942 = vrcp.f32 %v540_v1  ;;  %v944_v18 = vmul.f32 %v1935_v5, %v2504_v26  ;;  %1780 = vmatpush3.bf16.msra.mxu0 %v1894_v3 }
 0x603   : > { %v1937_v6 = vpop.eup %1936  ;;  %1781 = vmatprep.subr.bf16.mxu0 %v2128_v10 }
 0x604   : > { %v943_v4 = vmul.f32 %v1937_v6, %v2508_v28  ;;  %v543_v7 = vpop.xlane.xlu1 %542 }
 0x605   : > { %1944 = vrcp.f32 %v543_v7  ;;  %v1895_v7 = vld [vmem:[#allocation8 + $0x8] sm:$0xff]  }
 0x606   : > { %v945_v8 = vpack.c.bf16 %v944_v18, %v943_v4  ;;  %1946 = vrcp.f32 %v673_v59  ;;  %1782 = vmatpush3.bf16.msra.mxu0 %v1895_v7 }
 0x607   : > { %v1939_v12 = vpop.eup %1938  ;;  %1948 = vrcp.f32 %v676_v58  ;;  %1783 = vmatprep.subr.bf16.mxu0 %v2128_v10 }
 0x608   : > { %v1075_v13 = vmul.f32 %v1939_v12, %v2514_v31  ;;  %v683_v26 = vpop.permute.xlu1 %682  ;;  %1950 = vrcp.f32 %v805_v61 }
 0x609   : > { %1952 = vrcp.f32 %v808_v60 }
 0x60b   : > { %v1941_v14 = vpop.eup %1940 }
 0x60c   : > { %v1076_v11 = vmul.f32 %v1941_v14, %v2520_v34  ;;  %v1943_v17 = vpop.eup %1942 }
 0x60d   : > { %v546_v21 = vmul.f32 %v1943_v17, %v2512_v30 }
 0x60e   : > { %v1077_v19 = vpack.c.bf16 %v1076_v11, %v1075_v13  ;;  %v1897_v11 = vld [vmem:[#allocation8 + $0x18] sm:$0xff]  }
 0x60f   : > { %v1945_v20 = vpop.eup %1944 }
 0x610   : > { %v547_v23 = vmul.f32 %v1945_v20, %v2524_v36  ;;  %v1947_v16 = vpop.eup %1946 }
 0x611   : > { %v1949_v27 = vpop.eup %1948  ;;  %v679_v28 = vmul.f32 %v1947_v16, %v2491_v15 }
 0x612   : > { %v548_v25 = vpack.c.bf16 %v547_v23, %v546_v21  ;;  %v680_v29 = vmul.f32 %v1949_v27, %v2487_v9  ;;  %v1951_v30 = vpop.eup %1950 }
 0x613   : > { %v1953_v33 = vpop.eup %1952  ;;  %v811_v34 = vmul.f32 %v1951_v30, %v2500_v24 }
 0x614   : > { %1704 = vmatmul.mubr.msk.bf16.vlgmr.msra.gmra.mrb[12].mxu1 %vm404_vm3, %v548_v25  ;;  %v681_v31 = vpack.c.bf16 %v680_v29, %v679_v28  ;;  %v812_v35 = vmul.f32 %v1953_v33, %v2496_v22 }
 0x615   : > { %1714 = vmatpush3.bf16.msra.mxu1 %v683_v26  ;;  %1715 = vmatprep.mubr.msk.bf16.mxu1 %vm2129_vm1, %v2128_v10 }
 0x616   : > { %1725 = vmatprep.subr.bf16.mxu1 %v2128_v10  ;;  %v813_v36 = vpack.c.bf16 %v812_v35, %v811_v34 }
 0x61c   : > { %1716 = vmatmul.mubr.msk.bf16.vlgmr.msra.gmra.mrb[16].mxu1 %vm404_vm3, %v681_v31 }
 0x61d   : > { %1727 = vmatprep.mubr.msk.bf16.mxu1 %vm2129_vm1, %v2128_v10 }
 0x631   : > { %v1201_v32 = vpop.xlane.xlu0 %1200 }
 0x635   : > { %v815_v15 = vpop.permute.xlu0 %814 }
 0x636   : > { %1726 = vmatpush3.bf16.msra.mxu1 %v815_v15 }
 0x637   : > { %1737 = vmatprep.subr.bf16.mxu1 %v2128_v10 }
 0x639   : > { %v1204_v9 = vpop.xlane.xlu1 %1203  ;;  %1728 = vmatmul.mubr.msk.bf16.vlgmr.msra.gmra.mrb[20].mxu1 %vm404_vm3, %v813_v36  ;;  %v1079_v22 = vpop.permute.xlu0 %1078 }
 0x63a   : > { %1739 = vmatprep.mubr.msk.bf16.mxu1 %vm2129_vm1, %v2128_v10  ;;  %1954 = vrcp.f32 %v1204_v9 }
 0x63b   : > { %1956 = vrcp.f32 %v1201_v32 }
 0x63d   : > { %v1333_v37 = vpop.xlane.xlu1 %1332  ;;  %v1211_v42 = vpop.permute.xlu0 %1210 }
 0x641   : > { %v1336_v39 = vpop.xlane.xlu1 %1335  ;;  %v1343_v50 = vpop.permute.xlu0 %1342 }
 0x642   : > { %1958 = vrcp.f32 %v1336_v39  ;;  %v1633_v39 = vld [vmem:[%s2679_s3] ss:$0 sm:$0xff] }
 0x643   : > { %1960 = vrcp.f32 %v1333_v37 }
 0x644   : > { %v1955_v24 = vpop.eup %1954 }
 0x645   : > { %v947_v40 = vpop.permute.xlu1 %946  ;;  %v1957_v43 = vpop.eup %1956  ;;  %v1208_v45 = vmul.f32 %v1955_v24, %v2540_v55 }
 0x646   : > { %1738 = vmatpush3.bf16.msra.mxu1 %v947_v40  ;;  %v1207_v46 = vmul.f32 %v1957_v43, %v2536_v53 }
 0x647   : > { %1749 = vmatprep.subr.bf16.mxu1 %v2128_v10 }
 0x648   : > { %v1209_v48 = vpack.c.bf16 %v1208_v45, %v1207_v46 }
 0x649   : > { %1740 = vmatmul.mubr.msk.bf16.vlgmr.msra.gmra.mrb[24].mxu1 %vm404_vm3, %v945_v8  ;;  %v1896_v8 = vld [vmem:[#allocation8 + $0x10] sm:$0xff]  }
 0x64a   : > { %1750 = vmatpush3.bf16.msra.mxu1 %v1079_v22  ;;  %1751 = vmatprep.mubr.msk.bf16.mxu1 %vm2129_vm1, %v2128_v10 }
 0x64b   : > { %1761 = vmatprep.subr.bf16.mxu1 %v2128_v10  ;;  %1784 = vmatpush3.bf16.msra.mxu0 %v1896_v8 }
 0x64c   : > { %v1959_v49 = vpop.eup %1958  ;;  %1785 = vmatprep.subr.bf16.mxu0 %v2128_v10 }
 0x64d   : > { %v1961_v51 = vpop.eup %1960  ;;  %v1340_v52 = vmul.f32 %v1959_v49, %v2548_v56 }
 0x64e   : > { %v1339_v54 = vmul.f32 %v1961_v51, %v2544_v44 }
 0x64f   : > { %1786 = vmatpush3.bf16.msra.mxu0 %v1897_v11 }
 0x650   : > { %v1341_v38 = vpack.c.bf16 %v1340_v52, %v1339_v54 }
 0x651   : > { %1752 = vmatmul.mubr.msk.bf16.vlgmr.msra.gmra.mrb[28].mxu1 %vm404_vm3, %v1077_v19 }
 0x652   : > { %1762 = vmatpush3.bf16.msra.mxu1 %v1211_v42  ;;  %1763 = vmatprep.mubr.msk.bf16.mxu1 %vm2129_vm1, %v2128_v10 }
 0x653   : > { %1773 = vmatprep.subr.bf16.mxu1 %v2128_v10 }
 0x659   : > { %1764 = vmatmul.mubr.msk.bf16.vlgmr.msra.gmra.mrb[32].mxu1 %vm404_vm3, %v1209_v48 }
 0x65a   : > { %1774 = vmatpush3.bf16.msra.mxu1 %v1343_v50  ;;  %1775 = vmatprep.mubr.msk.bf16.mxu1 %vm2129_vm1, %v2128_v10 }
 0x661   : > { %1776 = vmatmul.mubr.msk.bf16.vlgmr.msra.gmra.mrb[36].mxu1 %vm404_vm3, %v1341_v38 }
 0x6e7   : > { %v590_v55 = vpop.f32.mrb[12].mxu1 }
 0x6e8   : > { %599 = vrot.lane.b32.xlu0 %v590_v55, %s2144_s24  ;;  %v1705_v53 = vpop.f32.mrb[13].mxu1 }
 0x6e9   : > { %v593_v41 = vpop.f32.mrb[14].mxu1 }
 0x6ea   : > { %601 = vrot.lane.b32.xlu1 %v593_v41, %s2144_s24  ;;  %v1706_v47 = vpop.f32.mrb[15].mxu1 }
 0x6ef   : > { %v722_v57 = vpop.f32.mrb[16].mxu1 }
 0x6f0   : > { %731 = vrot.lane.b32.xlu0 %v722_v57, %s2143_s13  ;;  %v1717_v58 = vpop.f32.mrb[17].mxu1 }
 0x6f1   : > { %v725_v59 = vpop.f32.mrb[18].mxu1 }
 0x6f2   : > { %733 = vrot.lane.b32.xlu1 %v725_v59, %s2143_s13  ;;  %v1718_v56 = vpop.f32.mrb[19].mxu1 }
 0x70c   : > { %v854_v44 = vpop.f32.mrb[20].mxu1 }
 0x70d   : > { %863 = vrot.lane.b32.xlu0 %v854_v44, %s2142_s12  ;;  %v1729_v60 = vpop.f32.mrb[21].mxu1 }
 0x70e   : > { %v857_v61 = vpop.f32.mrb[22].mxu1 }
 0x70f   : > { %865 = vrot.lane.b32.xlu1 %v857_v61, %s2142_s12  ;;  %v1730_v62 = vpop.f32.mrb[23].mxu1 }
 0x71c   : > { %v986_v63 = vpop.f32.mrb[24].mxu1 }
 0x71d   : > { %995 = vrot.lane.b32.xlu0 %v986_v63, %s2140_s29  ;;  %v1741_v0 = vpop.f32.mrb[25].mxu1 }
 0x71e   : > { %v989_v1 = vpop.f32.mrb[26].mxu1 }
 0x71f   : > { %997 = vrot.lane.b32.xlu1 %v989_v1, %s2140_s29  ;;  %v1742_v2 = vpop.f32.mrb[27].mxu1  ;;  %s2052_s29 = sshll.u32 %s2145_s20, 4  ;;  %s2053_s29 = int_to_ptr.vmem [resolvable:$false] %s2052_s29 }
 0x720   : > { %s2054_s5 = scalar_lea.vmem %s2053_s29, 512  ;;  %p2055_p5 = scmp.lt.s32.totalorder %s2624_s8, %s2053_s29 }
 0x724   : > { %v1118_v5 = vpop.f32.mrb[28].mxu1 }
 0x725   : > { %1127 = vrot.lane.b32.xlu0 %v1118_v5, %s2138_s27  ;;  %v1753_v6 = vpop.f32.mrb[29].mxu1 }
 0x726   : > { %v1121_v18 = vpop.f32.mrb[30].mxu1 }
 0x727   : > { %1129 = vrot.lane.b32.xlu1 %v1121_v18, %s2138_s27  ;;  %v1754_v4 = vpop.f32.mrb[31].mxu1  ;;  %s2048_s27 = scalar_lea.vmem %s2624_s8, 256 }
 0x728   : > { %p2049_p8 = scmp.ne.s32.totalorder %s2624_s8, %s2048_s27  ;;  %p2056_p9 = scmp.lt.s32.totalorder %s2054_s5, %s2048_s27 }
 0x72a   : > { %p2050_p1 = pnand %p2049_p8, %p2694_p0  ;;  %p2057_p12 = por %p2056_p9, %p2055_p5 }
 0x72c   : > { %v1250_v12 = vpop.f32.mrb[32].mxu1  ;;  %p2051_p3 = pneg %p2050_p1 }
 0x72d   : > { %1259 = vrot.lane.b32.xlu0 %v1250_v12, %s2137_s9  ;;  %v1765_v14 = vpop.f32.mrb[33].mxu1 }
 0x72e   : > { %v1253_v13 = vpop.f32.mrb[34].mxu1  ;;  %p2058_p2 = pnand %p2057_p12, %p2051_p3 }
 0x72f   : > { %1261 = vrot.lane.b32.xlu1 %v1253_v13, %s2137_s9  ;;  %v1766_v17 = vpop.f32.mrb[35].mxu1  ;;  %s2630_s9 = scalar_lea.hbm %s2680_s4, %s1645_s30 }
 0x734   : > { %v1382_v19 = vpop.f32.mrb[36].mxu1 }
 0x735   : > { %1391 = vrot.lane.b32.xlu0 %v1382_v19, %s2131_s23  ;;  %v1777_v20 = vpop.f32.mrb[37].mxu1 }
 0x736   : > { %v1385_v21 = vpop.f32.mrb[38].mxu1 }
 0x737   : > { %1393 = vrot.lane.b32.xlu1 %v1385_v21, %s2131_s23  ;;  %v1778_v23 = vpop.f32.mrb[39].mxu1 }
 0x75a   : > { %v600_v25 = vpop.permute.xlu0 %599 }
 0x75b   : > { %606 = vst.msk [vmem:[#allocation2] sm:$0xff] %vm605_vm4, %v600_v25 }
 0x75c   : > { %v602_v16 = vpop.permute.xlu1 %601 }
 0x75d   : > { %607 = vst.msk [vmem:[#allocation2 + $0x8] sm:$0xff] %vm605_vm4, %v602_v16 }
 0x762   : > { %v732_v26 = vpop.permute.xlu0 %731 }
 0x763   : > { %738 = vst.msk [vmem:[#allocation2] sm:$0xff] %vm737_vm5, %v732_v26 }
 0x764   : > { %v734_v27 = vpop.permute.xlu1 %733 }
 0x765   : > { %739 = vst.msk [vmem:[#allocation2 + $0x8] sm:$0xff] %vm737_vm5, %v734_v27 }
 0x77f   : > { %v864_v10 = vpop.permute.xlu0 %863 }
 0x780   : > { %870 = vst.msk [vmem:[#allocation2] sm:$0xff] %vm869_vm6, %v864_v10 }
 0x781   : > { %v866_v28 = vpop.permute.xlu1 %865 }
 0x782   : > { %871 = vst.msk [vmem:[#allocation2 + $0x8] sm:$0xff] %vm869_vm6, %v866_v28 }
 0x78f   : > { %v996_v29 = vpop.permute.xlu0 %995 }
 0x790   : > { %1002 = vst.msk [vmem:[#allocation2] sm:$0xff] %vm1001_vm7, %v996_v29 }
 0x791   : > { %v998_v31 = vpop.permute.xlu1 %997 }
 0x792   : > { %1003 = vst.msk [vmem:[#allocation2 + $0x8] sm:$0xff] %vm1001_vm7, %v998_v31 }
 0x797   : > { %v1128_v30 = vpop.permute.xlu0 %1127 }
 0x798   : > { %1134 = vst.msk [vmem:[#allocation2] sm:$0xff] %vm1133_vm8, %v1128_v30 }
 0x799   : > { %v1130_v32 = vpop.permute.xlu1 %1129 }
 0x79a   : > { %1135 = vst.msk [vmem:[#allocation2 + $0x8] sm:$0xff] %vm1133_vm8, %v1130_v32 }
 0x79f   : > { %v1260_v33 = vpop.permute.xlu0 %1259 }
 0x7a0   : > { %1266 = vst.msk [vmem:[#allocation2] sm:$0xff] %vm1265_vm9, %v1260_v33 }
 0x7a1   : > { %v1262_v34 = vpop.permute.xlu1 %1261 }
 0x7a2   : > { %1267 = vst.msk [vmem:[#allocation2 + $0x8] sm:$0xff] %vm1265_vm9, %v1262_v34 }
 0x7a7   : > { %v1392_v35 = vpop.permute.xlu0 %1391 }
 0x7a8   : > { %1398 = vst.msk [vmem:[#allocation2] sm:$0xff] %vm1397_vm10, %v1392_v35 }
 0x7a9   : > { %v1394_v15 = vpop.permute.xlu1 %1393 }
 0x7aa   : > { %1399 = vst.msk [vmem:[#allocation2 + $0x8] sm:$0xff] %vm1397_vm10, %v1394_v15 }
 0x7af   : > { %v1400_v36 = vld [vmem:[#allocation2] sm:$0xff] }
 0x7b1   : > { %v1401_v9 = vld [vmem:[#allocation2 + $0x8] sm:$0xff] }
 0x7b2   : > { %v1402_v37 = vpack.c.bf16 %v1401_v9, %v1400_v36 }
 0x7b4   : > { %1788 = vmatmul.mubr.msk.bf16.vlgmr.msra.gmra.mrb[28].mxu0 %vm301_vm0, %v1402_v37 }
 0x887   : > { %v1479_v40 = vpop.f32.mrb[28].mxu0 }
 0x888   : > { %v1480_v22 = vadd.f32 %v1633_v39, %v1479_v40  ;;  %v1789_v24 = vpop.f32.mrb[29].mxu0 }
 0x889   : > { %v1482_v42 = vpop.f32.mrb[30].mxu0 }
 0x88a   : > { %1486 = vst.msk [vmem:[%s244_s7] sm:$0xff] %vm301_vm0, %v1480_v22  ;;  %v1483_v43 = vadd.f32 %v1633_v39, %v1482_v42  ;;  %v1790_v45 = vpop.f32.mrb[31].mxu0 }
 0x88c   : > { %1487 = vst.msk [vmem:[%s244_s7 + $0x8] sm:$0xff] %vm301_vm0, %v1483_v43 }
 0x88d   : > { %2061 = shalt.err (!%p2058_p2)
}
 0x88e   : > { %s2062_s12 = scalar_lea.hbm %s2630_s9, 256  ;;  %s2066_s21 = scalar_lea.hbm %s2680_s4, 512 }
 0x88f   : > { %p2063_p13 = scmp.ne.s32.totalorder %s2630_s9, %s2062_s12  ;;  %p2067_p4 = scmp.lt.u32.totalorder %s2630_s9, %s2680_s4 }
 0x890   : > { %p2068_p7 = scmp.lt.u32.totalorder %s2066_s21, %s2062_s12  ;;  %p2070_p8 = scmp.lt.u32.totalorder %s2062_s12, %s2630_s9 }
 0x891   : > { %p2064_p6 = pnand %p2063_p13, %p2694_p0 }
 0x892   : > { %p2069_p11 = por %p2068_p7, %p2067_p4 }
 0x893   : > { %p2065_p10 = pneg %p2064_p6 }
 0x894   : > { %p2071_p1 = por %p2070_p8, %p2069_p11 }
 0x896   : > { %p2072_p3 = pnand %p2071_p1, %p2065_p10 }
 0x898   : > { %2075 = shalt.err (!%p2072_p3)
}
 0x899   : > { %s2146_s30 = smov 128  }
 0x89a   : > { %1801 = dma.vmem_to_hbm [thread:$0]  (%p2694_p0), %s2624_s8, 256, %s2630_s9, %s1489_s19, %s2146_s30, %s2146_s30, %s2144_s24  }
 0x89b PF: > { %s1517_s6 = sand.u32 1, %s2106_s15   ;;  %p2695_p5 = scmp.ne.s32.totalorder %s2685_s22, 0 }
 0x89c   : > { %p2696_p9 = scmp.ge.s32.totalorder %s2118_s18, 2  ;;  %s1518_s25 = scalar_lea.sflag [#allocation5], %s1517_s6 }
 0x89e   : > { %p1815_p12 = pnand %p2696_p9, %p2695_p5 }
 0x8a0   : > { %2101 = dma.done.wait (!%p1815_p12), %s1518_s25, 256  }
 0x8a1   : > { %2103 = vsyncadd (!%p1815_p12), %s1518_s25, 4294967040  ;;  %p18_p2 = scmp.ge.s32.totalorder %s2285_s11, 4   ;;  %s2697_s15 = smov %s2110_s16 }
 0x8a2   : > { %s2698_s16 = smov %s2114_s17  ;;  %s2699_s17 = smov %s2294_s14 }
 0x8a3   : > { %s2700_s18 = smov %s2285_s11  ;;  %20 = sbr.rel (!%p18_p2) target bundleno = 6 (0x6), region = 89 }
 0x8aa   :  { %1523 = vsyncpa [#allocation4], 1 }
 0x8ab   :  { %1525 = vsyncpa [#allocation4 + $0x1], 1 }
 0x8ac   :  { %1526 = vsyncpa [#allocation7], 1 }
 0x8ad   :  { %1527 = vsyncpa [#allocation5], 1 }
 0x8ae   :  { %1529 = vsyncpa [#allocation5 + $0x1], 1 }

</bundles_post_ra>
